<compile_context>
chip_gen: v6e
topology: v6e:2x2x1
jax: 0.10.0
libtpu: 0.0.40
codegen_flags: <defaults>
</compile_context>

<pallas_src>
import functools
import math

import jax
import jax.numpy as jnp
from jax.experimental import pallas as pl
from jax.experimental.pallas import tpu as pltpu


# --------------------------------------------------------------------------
# Small helpers
# --------------------------------------------------------------------------
def _cdiv(a, b):
    return -(-a // b)


def _round_up(x, m):
    return _cdiv(x, m) * m


def _lcm(a, b):
    return a * b // math.gcd(a, b)


def _vmem_capacity_bytes():
    try:
        info = pltpu.get_tpu_info()
        cap = int(getattr(info, "vmem_capacity_bytes", 0) or 0)
        if cap > 0:
            return cap
    except Exception:
        pass
    return 64 * 1024 * 1024  # conservative fallback (v7x physical VMEM)


def _vmem_budget_and_limit():
    """Generation-aware working-set budget and explicit vmem_limit_bytes."""
    cap = _vmem_capacity_bytes()
    budget = max(14 * 2**20, min(cap // 2, 64 * 2**20))
    limit = int(min(int(cap * 0.9), budget + 8 * 2**20))
    return budget, limit


@functools.lru_cache(maxsize=None)
def _single_buffer_mode():
    """pl.Buffered(1) if this JAX/Mosaic build supports single-buffering a
    grid-invariant input via BlockSpec(pipeline_mode=...); None otherwise.
    Probed once by lowering+compiling a trivial kernel so a real pallas_call
    never fails because of it."""
    if not hasattr(pl, "Buffered"):
        return None
    for make in (lambda: pl.Buffered(1), lambda: pl.Buffered(buffer_count=1)):
        try:
            mode = make()
        except Exception:
            continue
        try:
            spec = pl.BlockSpec((8, 128), lambda i: (0, 0), pipeline_mode=mode)

            def _copy(x_ref, o_ref):
                o_ref[...] = x_ref[...]

            fn = pl.pallas_call(
                _copy,
                out_shape=jax.ShapeDtypeStruct((8, 128), jnp.float32),
                grid=(1,),
                in_specs=[spec],
                out_specs=pl.BlockSpec((8, 128), lambda i: (0, 0)),
            )
            jax.jit(fn).lower(
                jax.ShapeDtypeStruct((8, 128), jnp.float32)).compile()
            return mode
        except Exception:
            continue
    return None


# --------------------------------------------------------------------------
# Kernel body
# --------------------------------------------------------------------------
def _make_kernel(approx_gate):
    def kernel(z_ref, wa_ref, ws_ref, a1_ref, s1_ref, o_ref):
        z = z_ref[...]                                                  # (T, D)
        # MXU: chunk-replicated weights -> lane-dense (T, CHUNK) results.
        a0 = jnp.dot(z, wa_ref[...], preferred_element_type=jnp.float32)
        s0 = jnp.dot(z, ws_ref[...], preferred_element_type=jnp.float32)
        a1 = a1_ref[...]                                                # (1, CHUNK)
        s1 = s1_ref[...]                                                # (1, CHUNK)
        # 2-gate (max-subtracted) softmax over (s0, s1) == sigmoid(s0 - s1).
        t = 1.0 + jnp.exp(s1 - s0)
        if approx_gate:
            g0 = pl.reciprocal(t, approx=True)   # EUP slot; frees the VPU
        else:
            g0 = 1.0 / t                         # exact, for f32-output parity
        o_ref[...] = (a1 + g0 * (a0 - a1)).astype(o_ref.dtype)
    return kernel


# --------------------------------------------------------------------------
# Tiling choices
# --------------------------------------------------------------------------
def _choose_chunk(d_model, nd, target_lanes):
    """Output-lane chunk width: a multiple of D (so the lane-replicated z-side
    weights are identical for every chunk -> grid-invariant) and of 128 (full
    unmasked vector stores), capped near target_lanes."""
    if nd <= max(target_lanes, 128):
        return nd
    base = _lcm(d_model, 128)
    if base >= nd:
        return nd
    k = max(1, target_lanes // base)
    chunk = min(k * base, nd)
    if chunk == nd:
        return nd
    # Prefer a chunk that divides ND (keeps even the last chunk full width),
    # as long as it stays within 2x of the target.
    for kk in range(k, 0, -1):
        cand = kk * base
        if nd % cand == 0 and 2 * cand >= chunk:
            return cand
    return chunk


def _choose_tile_rows(n_rows, d_model, chunk, n_chunks, out_itemsize,
                      compute_itemsize, vmem_budget, max_tile_rows,
                      resident_buffers):
    # Resident (grid-invariant) buffers: wa + ws; plus tiny a1/s1 (dbl-buffered).
    resident = resident_buffers * 2 * d_model * chunk * compute_itemsize
    resident += 2 * 2 * chunk * 4
    # Per-row, double-buffered: one output row chunk + one z row.
    per_row = 2 * (chunk * out_itemsize + d_model * compute_itemsize)
    avail = max(vmem_budget - resident, per_row * 8)
    cap = max(8, (avail // per_row) // 8 * 8)
    tile = int(max(8, min(cap, max_tile_rows, _round_up(n_rows, 8))))
    # v7x megacore: for small grids, prefer an even total step count so the
    # two TensorCores get equal work.
    if n_rows > 8 and _cdiv(n_rows, tile) * n_chunks < 8:
        while tile > 8 and (_cdiv(n_rows, tile) * n_chunks) % 2 == 1:
            tile -= 8
    return tile


# --------------------------------------------------------------------------
# One gated-connection call: (R, D) z rows -> (R, N*D) gated output
# --------------------------------------------------------------------------
def _gated_rows(z_rows, wa, ws, a1, s1, *, chunk, nd, out_dtype,
                max_tile_rows):
    R, D = z_rows.shape
    n_chunks = _cdiv(nd, chunk)
    budget, vmem_limit = _vmem_budget_and_limit()
    sb_mode = _single_buffer_mode()

    tile_rows = _choose_tile_rows(
        R, D, chunk, n_chunks,
        out_itemsize=jnp.dtype(out_dtype).itemsize,
        compute_itemsize=jnp.dtype(z_rows.dtype).itemsize,
        vmem_budget=budget, max_tile_rows=max_tile_rows,
        resident_buffers=1 if sb_mode is not None else 2)

    approx_gate = jnp.dtype(out_dtype) != jnp.dtype(jnp.float32)
    kernel = _make_kernel(approx_gate)

    def resident_spec(shape):
        if sb_mode is not None:
            return pl.BlockSpec(shape, lambda i, j: (0, 0),
                                pipeline_mode=sb_mode)
        return pl.BlockSpec(shape, lambda i, j: (0, 0))

    grid = (_cdiv(R, tile_rows), n_chunks)
    return pl.pallas_call(
        kernel,
        out_shape=jax.ShapeDtypeStruct((R, nd), out_dtype),
        grid=grid,
        in_specs=[
            pl.BlockSpec((tile_rows, D), lambda i, j: (i, 0)),   # z row tile
            resident_spec((D, chunk)),                           # tiled W1[0]
            resident_spec((D, chunk)),                           # tiled W2[0]
            pl.BlockSpec((1, chunk), lambda i, j: (0, j)),       # u @ W1[1]
            pl.BlockSpec((1, chunk), lambda i, j: (0, j)),       # u @ W2[1]
        ],
        out_specs=pl.BlockSpec((tile_rows, chunk), lambda i, j: (i, j)),
        compiler_params=pltpu.CompilerParams(
            dimension_semantics=("parallel", "parallel"),
            vmem_limit_bytes=vmem_limit),
    )(z_rows, wa, ws, a1, s1)


# --------------------------------------------------------------------------
# Public forward
# --------------------------------------------------------------------------
def spatial_temporal_embedding(z_inputs, z_targets, u, w1, w2, *,
                               out_dtype=None, compute_dtype=jnp.float32,
                               max_tile_rows=1024, chunk_lanes=2048):
    """Matches SpatialTemporalEmbedding.forward (noGC=False).

    out_dtype:     output store dtype.  Defaults to the input dtype (module
                   parity).  jnp.bfloat16 is strongly recommended for prod —
                   the output is N x larger than every input, so bf16 halves
                   the dominant HBM write traffic (accumulation stays f32).
    compute_dtype: dtype of z / replicated weights fed to the MXU (f32 default
                   for exact parity; bf16 halves resident VMEM and lifts MXU
                   throughput on v6e/v7x at a small precision cost).
    """
    B, P, D = z_inputs.shape
    Bt, Q, _ = z_targets.shape
    N = u.shape[0]
    ND = N * D
    if out_dtype is None:
        out_dtype = z_inputs.dtype

    f32 = jnp.float32
    hi = jax.lax.Precision.HIGHEST

    # Hoisted, grid-invariant u-side projections (tiny).
    a1 = jnp.dot(u.astype(f32), w1[1].astype(f32), precision=hi).reshape(1, ND)
    s1 = jnp.dot(u.astype(f32), w2[1].astype(f32), precision=hi).reshape(1, ND)

    # Lane-replicated z-side weights, only to the chunk width:
    #   (z @ wa)[t, n*D + d] == (z @ W1[0])[t, d]  for every node n in a chunk.
    chunk = _choose_chunk(D, ND, chunk_lanes)
    reps = chunk // D
    wa = jnp.tile(w1[0].astype(compute_dtype), (1, reps))        # (D, chunk)
    ws = jnp.tile(w2[0].astype(compute_dtype), (1, reps))        # (D, chunk)

    def run(z):
        rows = z.shape[0] * z.shape[1]
        zr = z.reshape(rows, D).astype(compute_dtype)
        return _gated_rows(zr, wa, ws, a1, s1, chunk=chunk, nd=ND,
                           out_dtype=out_dtype, max_tile_rows=max_tile_rows)

    # (rows, N*D) -> (B, *, N, D) is a free row-major dim split (no copy).
    c_inputs = run(z_inputs).reshape(B, P, N, D)
    c_targets = run(z_targets).reshape(Bt, Q, N, D)
    return c_inputs, c_targets


# --------------------------------------------------------------------------
# Reference + test
# --------------------------------------------------------------------------
def _reference(z_inputs, z_targets, u, w1, w2):
    """Pure-JAX reference mirroring the PyTorch math (max-subtracted softmax)."""
    hi = jax.lax.Precision.HIGHEST

    def gat(z):
        a0 = jnp.einsum("bpc,cd->bpd", z, w1[0], precision=hi)
        s0 = jnp.einsum("bpc,cd->bpd", z, w2[0], precision=hi)
        a1 = jnp.einsum("nc,cd->nd", u, w1[1], precision=hi)
        s1 = jnp.einsum("nc,cd->nd", u, w2[1], precision=hi)
        s0b = s0[:, :, None, :]
        s1b = s1[None, None, :, :]
        m = jnp.maximum(s0b, s1b)
        e0 = jnp.exp(s0b - m)
        e1 = jnp.exp(s1b - m)
        return (a0[:, :, None, :] * e0 + a1[None, None, :, :] * e1) / (e0 + e1)

    return gat(z_inputs), gat(z_targets)


def _xavier_normal(key, shape):
    # PyTorch xavier_normal_ on a (G, d_k, d_model) tensor:
    #   fan_in = d_k * d_model, fan_out = G * d_model
    g, dk, dm = shape
    fan_in = dk * dm
    fan_out = g * dm
    std = (2.0 / (fan_in + fan_out)) ** 0.5
    return std * jax.random.normal(key, shape, dtype=jnp.float32)


if __name__ == "__main__":
    B, P, Q, N, D = 2, 8, 4, 16, 32

    key = jax.random.PRNGKey(0)
    k_zi, k_zt, k_u, k_w1, k_w2 = jax.random.split(key, 5)

    z_inputs = jax.random.normal(k_zi, (B, P, D), dtype=jnp.float32)
    z_targets = jax.random.normal(k_zt, (B, Q, D), dtype=jnp.float32)
    u = jax.random.normal(k_u, (N, D), dtype=jnp.float32)

    w1 = _xavier_normal(k_w1, (2, D, D))
    w2 = _xavier_normal(k_w2, (2, D, D))

    ref_in, ref_tg = _reference(z_inputs, z_targets, u, w1, w2)

    # 1) Default (f32 output): exact parity with the PyTorch module numerics.
    fwd = jax.jit(spatial_temporal_embedding)
    c_inputs, c_targets = fwd(z_inputs, z_targets, u, w1, w2)
    jax.block_until_ready((c_inputs, c_targets))

    assert c_inputs.shape == (B, P, N, D)
    assert c_targets.shape == (B, Q, N, D)
    assert bool(jnp.all(jnp.isfinite(c_inputs)))
    assert bool(jnp.all(jnp.isfinite(c_targets)))
    assert jnp.allclose(c_inputs, ref_in, atol=1e-5, rtol=1e-5)
    assert jnp.allclose(c_targets, ref_tg, atol=1e-5, rtol=1e-5)

    # 2) Recommended production path: bf16 stores (halves HBM write bytes);
    #    accumulation stays f32, gate reciprocal moves to the EUP.
    fwd_bf16 = jax.jit(functools.partial(spatial_temporal_embedding,
                                         out_dtype=jnp.bfloat16))
    ci_b, ct_b = fwd_bf16(z_inputs, z_targets, u, w1, w2)
    jax.block_until_ready((ci_b, ct_b))

    assert ci_b.dtype == jnp.bfloat16 and ct_b.dtype == jnp.bfloat16
    assert jnp.allclose(ci_b.astype(jnp.float32), ref_in, atol=5e-2, rtol=5e-2)
    assert jnp.allclose(ct_b.astype(jnp.float32), ref_tg, atol=5e-2, rtol=5e-2)

    print("KERNEL_OK")
</pallas_src>

<mosaic_0001>
module attributes {stable_mosaic.version = 11 : i64} {
  func.func @kernel(%arg0: i32, %arg1: i32, %arg2: memref<8x32xf32, #tpu.memory_space<vmem>>, %arg3: memref<32x512xf32, #tpu.memory_space<vmem>>, %arg4: memref<32x512xf32, #tpu.memory_space<vmem>>, %arg5: memref<1x512xf32, #tpu.memory_space<vmem>>, %arg6: memref<1x512xf32, #tpu.memory_space<vmem>>, %arg7: memref<8x512xf32, #tpu.memory_space<vmem>>) attributes {dimension_semantics = [#tpu.dimension_semantics<parallel>, #tpu.dimension_semantics<parallel>], iteration_bounds = array<i64: 2, 1>, scalar_prefetch = 0 : i64, scratch_operands = 0 : i64, tpu.core_type = #tpu.core_type<tc>, window_params = [{transform_indices = @transform_0, window_bounds = array<i64: 8, 32>}, {pipeline_mode = #tpu.pipeline_mode<synchronous>, transform_indices = @transform_1, window_bounds = array<i64: 32, 512>}, {pipeline_mode = #tpu.pipeline_mode<synchronous>, transform_indices = @transform_2, window_bounds = array<i64: 32, 512>}, {transform_indices = @transform_3, window_bounds = array<i64: 1, 512>}, {transform_indices = @transform_4, window_bounds = array<i64: 1, 512>}, {transform_indices = @transform_5, window_bounds = array<i64: 8, 512>}]} {
    %c0 = arith.constant 0 : index
    %c0_0 = arith.constant 0 : index
    %0 = vector.load %arg2[%c0, %c0_0] : memref<8x32xf32, #tpu.memory_space<vmem>>, vector<8x32xf32>
    %c0_1 = arith.constant 0 : index
    %c0_2 = arith.constant 0 : index
    %1 = vector.load %arg3[%c0_1, %c0_2] : memref<32x512xf32, #tpu.memory_space<vmem>>, vector<32x512xf32>
    %cst = arith.constant dense<0.000000e+00> : vector<8x512xf32>
    %2 = tpu.matmul %0, %1, %cst {dimension_numbers = #tpu.dot_dimension_numbers<[1], [0], [0], [1], [0, 0, 1, 1], [], []>} : vector<8x32xf32>, vector<32x512xf32>, vector<8x512xf32> -> vector<8x512xf32>
    %c0_3 = arith.constant 0 : index
    %c0_4 = arith.constant 0 : index
    %3 = vector.load %arg4[%c0_3, %c0_4] : memref<32x512xf32, #tpu.memory_space<vmem>>, vector<32x512xf32>
    %cst_5 = arith.constant dense<0.000000e+00> : vector<8x512xf32>
    %4 = tpu.matmul %0, %3, %cst_5 {dimension_numbers = #tpu.dot_dimension_numbers<[1], [0], [0], [1], [0, 0, 1, 1], [], []>} : vector<8x32xf32>, vector<32x512xf32>, vector<8x512xf32> -> vector<8x512xf32>
    %c0_6 = arith.constant 0 : index
    %c0_7 = arith.constant 0 : index
    %5 = vector.load %arg5[%c0_6, %c0_7] : memref<1x512xf32, #tpu.memory_space<vmem>>, vector<1x512xf32>
    %c0_8 = arith.constant 0 : index
    %c0_9 = arith.constant 0 : index
    %6 = vector.load %arg6[%c0_8, %c0_9] : memref<1x512xf32, #tpu.memory_space<vmem>>, vector<1x512xf32>
    %7 = vector.broadcast %6 : vector<1x512xf32> to vector<8x512xf32>
    %8 = arith.subf %7, %4 : vector<8x512xf32>
    %9 = math.exp %8 : vector<8x512xf32>
    %cst_10 = arith.constant 1.000000e+00 : f32
    %10 = vector.broadcast %cst_10 : f32 to vector<8x512xf32>
    %11 = arith.addf %10, %9 : vector<8x512xf32>
    %cst_11 = arith.constant 1.000000e+00 : f32
    %12 = vector.broadcast %cst_11 : f32 to vector<8x512xf32>
    %13 = arith.divf %12, %11 : vector<8x512xf32>
    %14 = vector.broadcast %5 : vector<1x512xf32> to vector<8x512xf32>
    %15 = arith.subf %2, %14 : vector<8x512xf32>
    %16 = arith.mulf %13, %15 : vector<8x512xf32>
    %17 = vector.broadcast %5 : vector<1x512xf32> to vector<8x512xf32>
    %18 = arith.addf %17, %16 : vector<8x512xf32>
    %c0_12 = arith.constant 0 : index
    %c0_13 = arith.constant 0 : index
    %19 = vector.load %arg7[%c0_12, %c0_13] : memref<8x512xf32, #tpu.memory_space<vmem>>, vector<8x512xf32>
    tpu.vector_store %arg7[%c0_12, %c0_13], %18 {strides = array<i32>} : memref<8x512xf32, #tpu.memory_space<vmem>>, vector<8x512xf32>,
    return
  }
  func.func @transform_0(%arg0: i32, %arg1: i32) -> (i32, i32) {
    %c0_i32 = arith.constant 0 : i32
    %c0_i32_0 = arith.constant 0 : i32
    return %arg0, %c0_i32 : i32, i32
  }
  func.func @transform_1(%arg0: i32, %arg1: i32) -> (i32, i32) {
    %c0_i32 = arith.constant 0 : i32
    %c0_i32_0 = arith.constant 0 : i32
    %c0_i32_1 = arith.constant 0 : i32
    return %c0_i32, %c0_i32_0 : i32, i32
  }
  func.func @transform_2(%arg0: i32, %arg1: i32) -> (i32, i32) {
    %c0_i32 = arith.constant 0 : i32
    %c0_i32_0 = arith.constant 0 : i32
    %c0_i32_1 = arith.constant 0 : i32
    return %c0_i32, %c0_i32_0 : i32, i32
  }
  func.func @transform_3(%arg0: i32, %arg1: i32) -> (i32, i32) {
    %c0_i32 = arith.constant 0 : i32
    %c0_i32_0 = arith.constant 0 : i32
    return %c0_i32, %arg1 : i32, i32
  }
  func.func @transform_4(%arg0: i32, %arg1: i32) -> (i32, i32) {
    %c0_i32 = arith.constant 0 : i32
    %c0_i32_0 = arith.constant 0 : i32
    return %c0_i32, %arg1 : i32, i32
  }
  func.func @transform_5(%arg0: i32, %arg1: i32) -> (i32, i32) {
    %c0_i32 = arith.constant 0 : i32
    return %arg0, %arg1 : i32, i32
  }
}

module attributes {stable_mosaic.version = 11 : i64} {
  func.func @kernel(%arg0: i32, %arg1: i32, %arg2: memref<8x32xf32, #tpu.memory_space<vmem>>, %arg3: memref<32x512xf32, #tpu.memory_space<vmem>>, %arg4: memref<32x512xf32, #tpu.memory_space<vmem>>, %arg5: memref<1x512xf32, #tpu.memory_space<vmem>>, %arg6: memref<1x512xf32, #tpu.memory_space<vmem>>, %arg7: memref<8x512xf32, #tpu.memory_space<vmem>>) attributes {dimension_semantics = [#tpu.dimension_semantics<parallel>, #tpu.dimension_semantics<parallel>], iteration_bounds = array<i64: 1, 1>, scalar_prefetch = 0 : i64, scratch_operands = 0 : i64, tpu.core_type = #tpu.core_type<tc>, window_params = [{transform_indices = @transform_0, window_bounds = array<i64: 8, 32>}, {pipeline_mode = #tpu.pipeline_mode<synchronous>, transform_indices = @transform_1, window_bounds = array<i64: 32, 512>}, {pipeline_mode = #tpu.pipeline_mode<synchronous>, transform_indices = @transform_2, window_bounds = array<i64: 32, 512>}, {transform_indices = @transform_3, window_bounds = array<i64: 1, 512>}, {transform_indices = @transform_4, window_bounds = array<i64: 1, 512>}, {transform_indices = @transform_5, window_bounds = array<i64: 8, 512>}]} {
    %c0 = arith.constant 0 : index
    %c0_0 = arith.constant 0 : index
    %0 = vector.load %arg2[%c0, %c0_0] : memref<8x32xf32, #tpu.memory_space<vmem>>, vector<8x32xf32>
    %c0_1 = arith.constant 0 : index
    %c0_2 = arith.constant 0 : index
    %1 = vector.load %arg3[%c0_1, %c0_2] : memref<32x512xf32, #tpu.memory_space<vmem>>, vector<32x512xf32>
    %cst = arith.constant dense<0.000000e+00> : vector<8x512xf32>
    %2 = tpu.matmul %0, %1, %cst {dimension_numbers = #tpu.dot_dimension_numbers<[1], [0], [0], [1], [0, 0, 1, 1], [], []>} : vector<8x32xf32>, vector<32x512xf32>, vector<8x512xf32> -> vector<8x512xf32>
    %c0_3 = arith.constant 0 : index
    %c0_4 = arith.constant 0 : index
    %3 = vector.load %arg4[%c0_3, %c0_4] : memref<32x512xf32, #tpu.memory_space<vmem>>, vector<32x512xf32>
    %cst_5 = arith.constant dense<0.000000e+00> : vector<8x512xf32>
    %4 = tpu.matmul %0, %3, %cst_5 {dimension_numbers = #tpu.dot_dimension_numbers<[1], [0], [0], [1], [0, 0, 1, 1], [], []>} : vector<8x32xf32>, vector<32x512xf32>, vector<8x512xf32> -> vector<8x512xf32>
    %c0_6 = arith.constant 0 : index
    %c0_7 = arith.constant 0 : index
    %5 = vector.load %arg5[%c0_6, %c0_7] : memref<1x512xf32, #tpu.memory_space<vmem>>, vector<1x512xf32>
    %c0_8 = arith.constant 0 : index
    %c0_9 = arith.constant 0 : index
    %6 = vector.load %arg6[%c0_8, %c0_9] : memref<1x512xf32, #tpu.memory_space<vmem>>, vector<1x512xf32>
    %7 = vector.broadcast %6 : vector<1x512xf32> to vector<8x512xf32>
    %8 = arith.subf %7, %4 : vector<8x512xf32>
    %9 = math.exp %8 : vector<8x512xf32>
    %cst_10 = arith.constant 1.000000e+00 : f32
    %10 = vector.broadcast %cst_10 : f32 to vector<8x512xf32>
    %11 = arith.addf %10, %9 : vector<8x512xf32>
    %cst_11 = arith.constant 1.000000e+00 : f32
    %12 = vector.broadcast %cst_11 : f32 to vector<8x512xf32>
    %13 = arith.divf %12, %11 : vector<8x512xf32>
    %14 = vector.broadcast %5 : vector<1x512xf32> to vector<8x512xf32>
    %15 = arith.subf %2, %14 : vector<8x512xf32>
    %16 = arith.mulf %13, %15 : vector<8x512xf32>
    %17 = vector.broadcast %5 : vector<1x512xf32> to vector<8x512xf32>
    %18 = arith.addf %17, %16 : vector<8x512xf32>
    %c0_12 = arith.constant 0 : index
    %c0_13 = arith.constant 0 : index
    %19 = vector.load %arg7[%c0_12, %c0_13] : memref<8x512xf32, #tpu.memory_space<vmem>>, vector<8x512xf32>
    tpu.vector_store %arg7[%c0_12, %c0_13], %18 {strides = array<i32>} : memref<8x512xf32, #tpu.memory_space<vmem>>, vector<8x512xf32>,
    return
  }
  func.func @transform_0(%arg0: i32, %arg1: i32) -> (i32, i32) {
    %c0_i32 = arith.constant 0 : i32
    %c0_i32_0 = arith.constant 0 : i32
    return %arg0, %c0_i32 : i32, i32
  }
  func.func @transform_1(%arg0: i32, %arg1: i32) -> (i32, i32) {
    %c0_i32 = arith.constant 0 : i32
    %c0_i32_0 = arith.constant 0 : i32
    %c0_i32_1 = arith.constant 0 : i32
    return %c0_i32, %c0_i32_0 : i32, i32
  }
  func.func @transform_2(%arg0: i32, %arg1: i32) -> (i32, i32) {
    %c0_i32 = arith.constant 0 : i32
    %c0_i32_0 = arith.constant 0 : i32
    %c0_i32_1 = arith.constant 0 : i32
    return %c0_i32, %c0_i32_0 : i32, i32
  }
  func.func @transform_3(%arg0: i32, %arg1: i32) -> (i32, i32) {
    %c0_i32 = arith.constant 0 : i32
    %c0_i32_0 = arith.constant 0 : i32
    return %c0_i32, %arg1 : i32, i32
  }
  func.func @transform_4(%arg0: i32, %arg1: i32) -> (i32, i32) {
    %c0_i32 = arith.constant 0 : i32
    %c0_i32_0 = arith.constant 0 : i32
    return %c0_i32, %arg1 : i32, i32
  }
  func.func @transform_5(%arg0: i32, %arg1: i32) -> (i32, i32) {
    %c0_i32 = arith.constant 0 : i32
    return %arg0, %arg1 : i32, i32
  }
}

</mosaic_0001>

<bundles_post_ra>
// kernel: tile.11
= control target key start
LH: loop header
LB: loop body
LE: loop exit
PB: predicated region body
PF: predicated region fallthrough
CT: control target
= control target key end

     0   :  { %vm118_vm0 = vcmask 1043458   ;;  %s158_s6 = smov 3  ;;  %vm123_vm1 = vcmask 1045508   ;;  %vm128_vm2 = vcmask 1047558   ;;  %s161_s9 = smov 12  ;;  %vm3_vm3 = vcmask 261120   ;;  %s2648_s0 = inlined_call_operand.vmem [shape: f32[32,16,32], index: 0, kind: input, shape index: {}]   ;;  %s2649_s1 = inlined_call_operand.vmem [shape: f32[32,512], index: 1, kind: output, shape index: {}]  }
   0x1   :  { %v1268_v0 = vld [vmem:[%s2648_s0 + $0x103] ss:$16 sm:%s158_s6]   ;;  %s166_s10 = smov 48  ;;  %s171_s15 = smov 192  ;;  %v1223_v54 = vld [vmem:[%s2648_s0 + $0x80] ss:$4 sm:$0xff]  }
   0x2   :  { %v1269_v1 = vld [vmem:[%s2648_s0 + $0x103] ss:$16 sm:%s161_s9]   ;;  %s113_s16 = smov 3  ;;  %s116_s21 = smov 12  ;;  %vm132_vm4 = vcmask 1048320   ;;  %vm499_vm5 = vcmask 785920  }
   0x3   :  { %v1270_v2 = vld [vmem:[%s2648_s0 + $0x103] ss:$16 sm:%s166_s10]   ;;  %v164_v3 = vsel %vm118_vm0, %v1269_v1, %v1268_v0  ;;  %s121_s22 = smov 48  ;;  %s126_s27 = smov 192  ;;  %v1226_v0 = vld [vmem:[%s2648_s0 + $0xa0] ss:$4 sm:$0xff]  }
   0x4   :  { %v1271_v4 = vld [vmem:[%s2648_s0 + $0x103] ss:$16 sm:%s171_s15]   ;;  %v169_v6 = vsel %vm123_vm1, %v1270_v2, %v164_v3  ;;  %s181_s28 = smov 3  ;;  %s184_s4 = smov 12  ;;  %vm866_vm6 = vcmask 523520  }
   0x5   :  { %v1259_v5 = vld [vmem:[%s2648_s0 + $0x3] ss:$16 sm:%s113_s16]   ;;  %v174_v9 = vsel %vm128_vm2, %v1271_v4, %v169_v6  ;;  %s189_s5 = smov 48  ;;  %s1499_s6 = smov 96   ;;  %v1229_v6 = vld [vmem:[%s2648_s0 + $0xc0] ss:$4 sm:$0xff]  }
   0x6   :  { %v1260_v7 = vld [vmem:[%s2648_s0 + $0x3] ss:$16 sm:%s116_s21]   ;;  %175 = vrot.lane.b32.xlu1 %v174_v9, %s1499_s6  ;;  %s194_s9 = smov 192  ;;  %s135_s10 = smov 3 }
   0x7   :  { %v1261_v8 = vld [vmem:[%s2648_s0 + $0x3] ss:$16 sm:%s121_s22]   ;;  %v119_v10 = vsel %vm118_vm0, %v1260_v7, %v1259_v5  ;;  %s138_s15 = smov 12  ;;  %s143_s16 = smov 48 }
   0x8   :  { %v1262_v11 = vld [vmem:[%s2648_s0 + $0x3] ss:$16 sm:%s126_s27]   ;;  %v124_v13 = vsel %vm123_vm1, %v1261_v8, %v119_v10  ;;  %s148_s19 = smov 192  ;;  %s227_s20 = smov 3 }
   0x9   :  { %v1273_v12 = vld [vmem:[%s2648_s0 + $0x183] ss:$16 sm:%s181_s28]   ;;  %v129_v15 = vsel %vm128_vm2, %v1262_v11, %v124_v13  ;;  %s230_s25 = smov 12  ;;  %s235_s26 = smov 48  ;;  %v1283_v27 = vld [vmem:[%s2648_s0 + $0x87] ss:$16 sm:%s227_s20]  }
   0xa   :  { %v1274_v14 = vld [vmem:[%s2648_s0 + $0x183] ss:$16 sm:%s184_s4]   ;;  %130 = vrot.lane.b32.xlu0 %v129_v15, %s1499_s6  ;;  %s240_s29 = smov 192  ;;  %s204_s30 = smov 3 }
   0xb   :  { %v187_v16 = vsel %vm118_vm0, %v1274_v14, %v1273_v12  ;;  %v1275_v17 = vld [vmem:[%s2648_s0 + $0x183] ss:$16 sm:%s189_s5]   ;;  %v1284_v28 = vld [vmem:[%s2648_s0 + $0x87] ss:$16 sm:%s230_s25]   ;;  %s207_s7 = smov 12  ;;  %s212_s8 = smov 48 }
   0xc   :  { %v1276_v18 = vld [vmem:[%s2648_s0 + $0x183] ss:$16 sm:%s194_s9]   ;;  %v192_v19 = vsel %vm123_vm1, %v1275_v17, %v187_v16  ;;  %v233_v30 = vsel %vm118_vm0, %v1284_v28, %v1283_v27  ;;  %v1285_v31 = vld [vmem:[%s2648_s0 + $0x87] ss:$16 sm:%s235_s26]   ;;  %s217_s13 = smov 192  ;;  %s276_s17 = smov 12 }
   0xd   :  { %v1263_v20 = vld [vmem:[%s2648_s0 + $0x83] ss:$16 sm:%s135_s10]   ;;  %v197_v21 = vsel %vm128_vm2, %v1276_v18, %v192_v19  ;;  %v1286_v32 = vld [vmem:[%s2648_s0 + $0x87] ss:$16 sm:%s240_s29]   ;;  %v238_v33 = vsel %vm123_vm1, %v1285_v31, %v233_v30  ;;  %s281_s22 = smov 48  ;;  %s286_s23 = smov 192 }
   0xe   :  { %v1264_v22 = vld [vmem:[%s2648_s0 + $0x83] ss:$16 sm:%s138_s15]   ;;  %198 = vrot.lane.b32.xlu1 %v197_v21, %s1499_s6  ;;  %v243_v35 = vsel %vm128_vm2, %v1286_v32, %v238_v33  ;;  %s250_s26 = smov 3  ;;  %s253_s2 = smov 12  ;;  %v1232_v16 = vld [vmem:[%s2648_s0 + $0xe0] ss:$4 sm:$0xff]  }
   0xf   :  { %v1265_v23 = vld [vmem:[%s2648_s0 + $0x83] ss:$16 sm:%s143_s16]   ;;  %v141_v24 = vsel %vm118_vm0, %v1264_v22, %v1263_v20  ;;  %v1278_v34 = vld [vmem:[%s2648_s0 + $0x7] ss:$16 sm:%s204_s30]   ;;  %s273_s16 = smov 3  ;;  %s258_s3 = smov 48 }
  0x10   :  { %v1266_v25 = vld [vmem:[%s2648_s0 + $0x83] ss:$16 sm:%s148_s19]   ;;  %v146_v26 = vsel %vm123_vm1, %v1265_v23, %v141_v24  ;;  %v1279_v36 = vld [vmem:[%s2648_s0 + $0x7] ss:$16 sm:%s207_s7]   ;;  %s263_s9 = smov 192  ;;  %s319_s12 = smov 3 }
  0x11   :  { %v151_v29 = vsel %vm128_vm2, %v1266_v25, %v146_v26  ;;  %v1280_v37 = vld [vmem:[%s2648_s0 + $0x7] ss:$16 sm:%s212_s8]   ;;  %v210_v38 = vsel %vm118_vm0, %v1279_v36, %v1278_v34  ;;  %s327_s18 = smov 48  ;;  %s332_s19 = smov 192  ;;  %v1303_v56 = vld [vmem:[%s2648_s0 + $0x8b] ss:$16 sm:%s319_s12]  }
  0x12   :  { %152 = vrot.lane.b32.xlu0 %v151_v29, %s1499_s6  ;;  %244 = vrot.lane.b32.xlu1 %v243_v35, %s1499_s6  ;;  %v1281_v39 = vld [vmem:[%s2648_s0 + $0x7] ss:$16 sm:%s217_s13]   ;;  %v215_v40 = vsel %vm123_vm1, %v1280_v37, %v210_v38  ;;  %s322_s13 = smov 12  ;;  %s299_s29 = smov 12 }
  0x13   :  { %v1293_v41 = vld [vmem:[%s2648_s0 + $0x187] ss:$16 sm:%s273_s16]   ;;  %v220_v43 = vsel %vm128_vm2, %v1281_v39, %v215_v40  ;;  %v1304_v57 = vld [vmem:[%s2648_s0 + $0x8b] ss:$16 sm:%s322_s13]   ;;  %s304_s30 = smov 48  ;;  %s309_s11 = smov 192 }
  0x14   :  { %v1294_v42 = vld [vmem:[%s2648_s0 + $0x187] ss:$16 sm:%s276_s17]   ;;  %1224 = vst.msk [vmem:[%s2649_s1 + $0x20] ss:$8 sm:$0xf] %vm3_vm3, %v1223_v54   ;;  %v325_v59 = vsel %vm118_vm0, %v1304_v57, %v1303_v56  ;;  %s365_s14 = smov 3 }
  0x15   :  { %v279_v44 = vsel %vm118_vm0, %v1294_v42, %v1293_v41  ;;  %v1295_v45 = vld [vmem:[%s2648_s0 + $0x187] ss:$16 sm:%s281_s22]   ;;  %s296_s22 = smov 3  ;;  %1225 = vst.msk [vmem:[%s2649_s1 + $0x1] ss:$8 sm:$0xf0] %vm3_vm3, %v1223_v54  }
  0x16   :  { %v1296_v46 = vld [vmem:[%s2648_s0 + $0x187] ss:$16 sm:%s286_s23]   ;;  %221 = vrot.lane.b32.xlu0 %v220_v43, %s1499_s6  ;;  %v284_v47 = vsel %vm123_vm1, %v1295_v45, %v279_v44  ;;  %s368_s15 = smov 12  ;;  %s378_s23 = smov 192  ;;  %v2_v31 = vld [vmem:[%s2648_s0] ss:$4 sm:$0xff]  }
  0x17   :  { %v1288_v48 = vld [vmem:[%s2648_s0 + $0x107] ss:$16 sm:%s250_s26]   ;;  %v289_v49 = vsel %vm128_vm2, %v1296_v46, %v284_v47  ;;  %v1305_v60 = vld [vmem:[%s2648_s0 + $0x8b] ss:$16 sm:%s327_s18]   ;;  %s350_s10 = smov 48  ;;  %s396_s16 = smov 48 }
  0x18   :  { %v1289_v50 = vld [vmem:[%s2648_s0 + $0x107] ss:$16 sm:%s253_s2]   ;;  %290 = vrot.lane.b32.xlu1 %v289_v49, %s1499_s6  ;;  %v330_v62 = vsel %vm123_vm1, %v1305_v60, %v325_v59  ;;  %1227 = vst.msk [vmem:[%s2649_s1 + $0x22] ss:$8 sm:$0xf] %vm3_vm3, %v1226_v0   ;;  %s424_s2 = smov 192 }
  0x19   :  { %v1290_v51 = vld [vmem:[%s2648_s0 + $0x107] ss:$16 sm:%s258_s3]   ;;  %v256_v52 = vsel %vm118_vm0, %v1289_v50, %v1288_v48  ;;  %v1306_v61 = vld [vmem:[%s2648_s0 + $0x8b] ss:$16 sm:%s332_s19]   ;;  %s355_s19 = smov 192  ;;  %s401_s21 = smov 192 }
  0x1a   :  { %v1291_v53 = vld [vmem:[%s2648_s0 + $0x107] ss:$16 sm:%s263_s9]   ;;  %v261_v55 = vsel %vm123_vm1, %v1290_v51, %v256_v52  ;;  %v1298_v63 = vld [vmem:[%s2648_s0 + $0xb] ss:$16 sm:%s296_s22]   ;;  %v335_v1 = vsel %vm128_vm2, %v1306_v61, %v330_v62  ;;  %s373_s22 = smov 48  ;;  %s345_s9 = smov 12 }
  0x1b   :  { %v266_v58 = vsel %vm128_vm2, %v1291_v53, %v261_v55  ;;  %v1299_v2 = vld [vmem:[%s2648_s0 + $0xb] ss:$16 sm:%s299_s29]   ;;  %1228 = vst.msk [vmem:[%s2649_s1 + $0x3] ss:$8 sm:$0xf0] %vm3_vm3, %v1226_v0   ;;  %s457_s24 = smov 3 }
  0x1c   :  { %267 = vrot.lane.b32.xlu0 %v266_v58, %s1499_s6  ;;  %v1300_v3 = vld [vmem:[%s2648_s0 + $0xb] ss:$16 sm:%s304_s30]   ;;  %336 = vrot.lane.b32.xlu1 %v335_v1, %s1499_s6  ;;  %v302_v4 = vsel %vm118_vm0, %v1299_v2, %v1298_v63  ;;  %s342_s30 = smov 3  ;;  %s460_s25 = smov 12 }
  0x1d   :  { %v1301_v5 = vld [vmem:[%s2648_s0 + $0xb] ss:$16 sm:%s309_s11]   ;;  %v307_v7 = vsel %vm123_vm1, %v1300_v3, %v302_v4  ;;  %1230 = vst.msk [vmem:[%s2649_s1 + $0x24] ss:$8 sm:$0xf] %vm3_vm3, %v1229_v6   ;;  %s465_s3 = smov 48 }
  0x1e   :  { %v1313_v8 = vld [vmem:[%s2648_s0 + $0x18b] ss:$16 sm:%s365_s14]   ;;  %1231 = vst.msk [vmem:[%s2649_s1 + $0x5] ss:$8 sm:$0xf0] %vm3_vm3, %v1229_v6   ;;  %v312_v10 = vsel %vm128_vm2, %v1301_v5, %v307_v7  ;;  %s470_s4 = smov 192 }
  0x1f   :  { %v1314_v9 = vld [vmem:[%s2648_s0 + $0x18b] ss:$16 sm:%s368_s15]   ;;  %1233 = vst.msk [vmem:[%s2649_s1 + $0x26] ss:$8 sm:$0xf] %vm3_vm3, %v1232_v16   ;;  %s391_s15 = smov 12 }
  0x20   :  { %v371_v11 = vsel %vm118_vm0, %v1314_v9, %v1313_v8  ;;  %v1315_v12 = vld [vmem:[%s2648_s0 + $0x18b] ss:$16 sm:%s373_s22]   ;;  %313 = vrot.lane.b32.xlu0 %v312_v10, %s1499_s6  ;;  %s411_s22 = smov 3  ;;  %1234 = vst.msk [vmem:[%s2649_s1 + $0x7] ss:$8 sm:$0xf0] %vm3_vm3, %v1232_v16  }
  0x21   :  { %v1316_v13 = vld [vmem:[%s2648_s0 + $0x18b] ss:$16 sm:%s378_s23]   ;;  %v376_v14 = vsel %vm123_vm1, %v1315_v12, %v371_v11  ;;  %s414_s23 = smov 12  ;;  %v1323_v23 = vld [vmem:[%s2648_s0 + $0x8f] ss:$16 sm:%s411_s22]   ;;  %s434_s12 = smov 3 }
  0x22   :  { %v1308_v15 = vld [vmem:[%s2648_s0 + $0x10b] ss:$16 sm:%s342_s30]   ;;  %v381_v17 = vsel %vm128_vm2, %v1316_v13, %v376_v14  ;;  %s419_s30 = smov 48  ;;  %v1324_v24 = vld [vmem:[%s2648_s0 + $0x8f] ss:$16 sm:%s414_s23]   ;;  %s442_s20 = smov 48 }
  0x23   :  { %v1309_v18 = vld [vmem:[%s2648_s0 + $0x10b] ss:$16 sm:%s345_s9]   ;;  %382 = vrot.lane.b32.xlu1 %v381_v17, %s1499_s6  ;;  %v417_v26 = vsel %vm118_vm0, %v1324_v24, %v1323_v23  ;;  %4 = vst.msk [vmem:[%s2649_s1] ss:$8 sm:$0xf] %vm3_vm3, %v2_v31   ;;  %s447_s29 = smov 192 }
  0x24   :  { %v1310_v19 = vld [vmem:[%s2648_s0 + $0x10b] ss:$16 sm:%s350_s10]   ;;  %v348_v20 = vsel %vm118_vm0, %v1309_v18, %v1308_v15  ;;  %s388_s10 = smov 3  ;;  %v1325_v27 = vld [vmem:[%s2648_s0 + $0x8f] ss:$16 sm:%s419_s30]   ;;  %s515_s13 = smov 192 }
  0x25   :  { %v1311_v21 = vld [vmem:[%s2648_s0 + $0x10b] ss:$16 sm:%s355_s19]   ;;  %v353_v22 = vsel %vm123_vm1, %v1310_v19, %v348_v20  ;;  %v1326_v28 = vld [vmem:[%s2648_s0 + $0x8f] ss:$16 sm:%s424_s2]   ;;  %v422_v29 = vsel %vm123_vm1, %v1325_v27, %v417_v26  ;;  %s437_s19 = smov 12  ;;  %s483_s27 = smov 12 }
  0x26   :  { %v358_v25 = vsel %vm128_vm2, %v1311_v21, %v353_v22  ;;  %v1318_v30 = vld [vmem:[%s2648_s0 + $0xf] ss:$16 sm:%s388_s10]   ;;  %v427_v32 = vsel %vm128_vm2, %v1326_v28, %v422_v29  ;;  %1213 = vst.msk [vmem:[%s2649_s1 - $0x1f] ss:$8 sm:$0xf0] %vm3_vm3, %v2_v31   ;;  %s488_s28 = smov 48 }
  0x27   :  { %359 = vrot.lane.b32.xlu0 %v358_v25, %s1499_s6  ;;  %v1319_v33 = vld [vmem:[%s2648_s0 + $0xf] ss:$16 sm:%s391_s15]   ;;  %428 = vrot.lane.b32.xlu1 %v427_v32, %s1499_s6  ;;  %s493_s9 = smov 192  ;;  %s548_s11 = smov 3 }
  0x28   :  { %v1320_v34 = vld [vmem:[%s2648_s0 + $0xf] ss:$16 sm:%s396_s16]   ;;  %v394_v35 = vsel %vm118_vm0, %v1319_v33, %v1318_v30  ;;  %v1214_v37 = vld [vmem:[%s2648_s0 + $0x20] ss:$4 sm:$0xff]   ;;  %s528_s7 = smov 12  ;;  %s533_s8 = smov 48 }
  0x29   :  { %v1321_v36 = vld [vmem:[%s2648_s0 + $0xf] ss:$16 sm:%s401_s21]   ;;  %v399_v38 = vsel %vm123_vm1, %v1320_v34, %v394_v35  ;;  %1215 = vst.msk [vmem:[%s2649_s1 + $0x2] ss:$8 sm:$0xf] %vm3_vm3, %v1214_v37   ;;  %s538_s16 = smov 192 }
  0x2a   :  { %v1333_v39 = vld [vmem:[%s2648_s0 + $0x18f] ss:$16 sm:%s457_s24]   ;;  %1216 = vst.msk [vmem:[%s2649_s1 - $0x1d] ss:$8 sm:$0xf0] %vm3_vm3, %v1214_v37   ;;  %v404_v41 = vsel %vm128_vm2, %v1321_v36, %v399_v38  ;;  %s574_s14 = smov 12 }
  0x2b   :  { %v1334_v40 = vld [vmem:[%s2648_s0 + $0x18f] ss:$16 sm:%s460_s25]   ;;  %405 = vrot.lane.b32.xlu0 %v404_v41, %s1499_s6  ;;  %v1217_v47 = vld [vmem:[%s2648_s0 + $0x40] ss:$4 sm:$0xff]   ;;  %s1500_s25 = smov 64   ;;  %s579_s15 = smov 48 }
  0x2c   :  { %v463_v42 = vsel %vm118_vm0, %v1334_v40, %v1333_v39  ;;  %v1335_v43 = vld [vmem:[%s2648_s0 + $0x18f] ss:$16 sm:%s465_s3]   ;;  %s502_s3 = smov 3  ;;  %1218 = vst.msk [vmem:[%s2649_s1 + $0x4] ss:$8 sm:$0xf] %vm3_vm3, %v1217_v47  }
  0x2d   :  { %v1336_v44 = vld [vmem:[%s2648_s0 + $0x18f] ss:$16 sm:%s470_s4]   ;;  %v468_v45 = vsel %vm123_vm1, %v1335_v43, %v463_v42  ;;  %s505_s4 = smov 12  ;;  %1219 = vst.msk [vmem:[%s2649_s1 - $0x1b] ss:$8 sm:$0xf0] %vm3_vm3, %v1217_v47  }
  0x2e   :  { %v1328_v46 = vld [vmem:[%s2648_s0 + $0x10f] ss:$16 sm:%s434_s12]   ;;  %v473_v48 = vsel %vm128_vm2, %v1336_v44, %v468_v45  ;;  %s510_s12 = smov 48  ;;  %v1220_v53 = vld [vmem:[%s2648_s0 + $0x60] ss:$4 sm:$0xff]   ;;  %s584_s24 = smov 192 }
  0x2f   :  { %v1329_v49 = vld [vmem:[%s2648_s0 + $0x10f] ss:$16 sm:%s437_s19]   ;;  %474 = vrot.lane.b32.xlu1 %v473_v48, %s1499_s6  ;;  %1221 = vst.msk [vmem:[%s2649_s1 + $0x6] ss:$8 sm:$0xf] %vm3_vm3, %v1220_v53   ;;  %s556_s19 = smov 48 }
  0x30   :  { %v1330_v50 = vld [vmem:[%s2648_s0 + $0x10f] ss:$16 sm:%s442_s20]   ;;  %v440_v51 = vsel %vm118_vm0, %v1329_v49, %v1328_v46  ;;  %s480_s20 = smov 3  ;;  %v1342_v55 = vld [vmem:[%s2648_s0 + $0x82] ss:$16 sm:%s502_s3]   ;;  %s620_s22 = smov 12 }
  0x31   :  { %v1331_v52 = vld [vmem:[%s2648_s0 + $0x10f] ss:$16 sm:%s447_s29]   ;;  %v445_v54 = vsel %vm123_vm1, %v1330_v50, %v440_v51  ;;  %v1343_v56 = vld [vmem:[%s2648_s0 + $0x82] ss:$16 sm:%s505_s4]   ;;  %s607_s29 = smov 192  ;;  %s625_s23 = smov 48 }
  0x32   :  { %1222 = vst.msk [vmem:[%s2649_s1 - $0x19] ss:$8 sm:$0xf0] %vm3_vm3, %v1220_v53   ;;  %v450_v57 = vsel %vm128_vm2, %v1331_v52, %v445_v54  ;;  %v508_v58 = vsel %vm118_vm0, %v1343_v56, %v1342_v55  ;;  %v1344_v59 = vld [vmem:[%s2648_s0 + $0x82] ss:$16 sm:%s510_s12]   ;;  %s551_s12 = smov 12 }
  0x33   :  { %v1345_v60 = vld [vmem:[%s2648_s0 + $0x82] ss:$16 sm:%s515_s13]   ;;  %451 = vrot.lane.b32.xlu0 %v450_v57, %s1499_s6  ;;  %v513_v61 = vsel %vm123_vm1, %v1344_v59, %v508_v58  ;;  %v1247_v63 = vld [vmem:[%s2648_s0 + $0x180] ss:$4 sm:$0xff]   ;;  %s630_s4 = smov 192  ;;  %s666_s2 = smov 12 }
  0x34   :  { %v1338_v62 = vld [vmem:[%s2648_s0 + $0x2] ss:$16 sm:%s480_s20]   ;;  %v518_v0 = vsel %vm128_vm2, %v1345_v60, %v513_v61  ;;  %s561_s20 = smov 192  ;;  %1248 = vst.msk [vmem:[%s2649_s1 + $0x60] ss:$8 sm:$0xf] %vm3_vm3, %v1247_v63  }
  0x35   :  { %v1339_v1 = vld [vmem:[%s2648_s0 + $0x2] ss:$16 sm:%s483_s27]   ;;  %1249 = vst.msk [vmem:[%s2649_s1 + $0x41] ss:$8 sm:$0xf0] %vm3_vm3, %v1247_v63   ;;  %519 = vrot.lane.b32.xlu1 %v518_v0, %s1500_s25  ;;  %s671_s3 = smov 48 }
  0x36   :  { %v1340_v2 = vld [vmem:[%s2648_s0 + $0x2] ss:$16 sm:%s488_s28]   ;;  %v486_v3 = vsel %vm118_vm0, %v1339_v1, %v1338_v62  ;;  %s525_s28 = smov 3  ;;  %v1250_v5 = vld [vmem:[%s2648_s0 + $0x1a0] ss:$4 sm:$0xff]   ;;  %s740_s21 = smov 48 }
  0x37   :  { %v1341_v4 = vld [vmem:[%s2648_s0 + $0x2] ss:$16 sm:%s493_s9]   ;;  %v491_v6 = vsel %vm123_vm1, %v1340_v2, %v486_v3  ;;  %1251 = vst.msk [vmem:[%s2649_s1 + $0x62] ss:$8 sm:$0xf] %vm3_vm3, %v1250_v5   ;;  %s653_s9 = smov 192 }
  0x38   :  { %v1352_v7 = vld [vmem:[%s2648_s0 + $0x182] ss:$16 sm:%s548_s11]   ;;  %1252 = vst.msk [vmem:[%s2649_s1 + $0x43] ss:$8 sm:$0xf0] %vm3_vm3, %v1250_v5   ;;  %v496_v9 = vsel %vm128_vm2, %v1341_v4, %v491_v6  ;;  %s709_s26 = smov 3 }
  0x39   :  { %v1353_v8 = vld [vmem:[%s2648_s0 + $0x182] ss:$16 sm:%s551_s12]   ;;  %497 = vrot.lane.b32.xlu0 %v496_v9, %s1500_s25  ;;  %v1253_v15 = vld [vmem:[%s2648_s0 + $0x1c0] ss:$4 sm:$0xff]   ;;  %s676_s12 = smov 192  ;;  %s778_s11 = smov 3 }
  0x3a   :  { %v554_v10 = vsel %vm118_vm0, %v1353_v8, %v1352_v7  ;;  %v1354_v11 = vld [vmem:[%s2648_s0 + $0x182] ss:$16 sm:%s556_s19]   ;;  %s594_s19 = smov 3  ;;  %1254 = vst.msk [vmem:[%s2649_s1 + $0x64] ss:$8 sm:$0xf] %vm3_vm3, %v1253_v15  }
  0x3b   :  { %v1355_v12 = vld [vmem:[%s2648_s0 + $0x182] ss:$16 sm:%s561_s20]   ;;  %v559_v13 = vsel %vm123_vm1, %v1354_v11, %v554_v10  ;;  %s597_s20 = smov 12  ;;  %1255 = vst.msk [vmem:[%s2649_s1 + $0x45] ss:$8 sm:$0xf0] %vm3_vm3, %v1253_v15  }
  0x3c   :  { %v1347_v14 = vld [vmem:[%s2648_s0 + $0x102] ss:$16 sm:%s525_s28]   ;;  %v564_v16 = vsel %vm128_vm2, %v1355_v12, %v559_v13  ;;  %s602_s28 = smov 48  ;;  %v1256_v21 = vld [vmem:[%s2648_s0 + $0x1e0] ss:$4 sm:$0xff]   ;;  %s786_s17 = smov 48 }
  0x3d   :  { %v1348_v17 = vld [vmem:[%s2648_s0 + $0x102] ss:$16 sm:%s528_s7]   ;;  %565 = vrot.lane.b32.xlu1 %v564_v16, %s1500_s25  ;;  %1257 = vst.msk [vmem:[%s2649_s1 + $0x66] ss:$8 sm:$0xf] %vm3_vm3, %v1256_v21   ;;  %s791_s18 = smov 192 }
  0x3e   :  { %v1349_v18 = vld [vmem:[%s2648_s0 + $0x102] ss:$16 sm:%s533_s8]   ;;  %v531_v19 = vsel %vm118_vm0, %v1348_v17, %v1347_v14  ;;  %s571_s8 = smov 3  ;;  %v1362_v23 = vld [vmem:[%s2648_s0 + $0x86] ss:$16 sm:%s594_s19]   ;;  %s758_s27 = smov 12 }
  0x3f   :  { %v1350_v20 = vld [vmem:[%s2648_s0 + $0x102] ss:$16 sm:%s538_s16]   ;;  %v536_v22 = vsel %vm123_vm1, %v1349_v18, %v531_v19  ;;  %v1363_v24 = vld [vmem:[%s2648_s0 + $0x86] ss:$16 sm:%s597_s20]   ;;  %s699_s16 = smov 192  ;;  %s832_s13 = smov 48 }
  0x40   :  { %1258 = vst.msk [vmem:[%s2649_s1 + $0x47] ss:$8 sm:$0xf0] %vm3_vm3, %v1256_v21   ;;  %v541_v25 = vsel %vm128_vm2, %v1350_v20, %v536_v22  ;;  %v600_v26 = vsel %vm118_vm0, %v1363_v24, %v1362_v23  ;;  %v1364_v27 = vld [vmem:[%s2648_s0 + $0x86] ss:$16 sm:%s602_s28]   ;;  %s640_s28 = smov 3 }
  0x41   :  { %v1365_v28 = vld [vmem:[%s2648_s0 + $0x86] ss:$16 sm:%s607_s29]   ;;  %542 = vrot.lane.b32.xlu0 %v541_v25, %s1500_s25  ;;  %v605_v29 = vsel %vm123_vm1, %v1364_v27, %v600_v26  ;;  %s643_s29 = smov 12  ;;  %v1235_v31 = vld [vmem:[%s2648_s0 + $0x100] ss:$4 sm:$0xff]   ;;  %s877_s6 = smov 48 }
  0x42   :  { %v1357_v30 = vld [vmem:[%s2648_s0 + $0x6] ss:$16 sm:%s571_s8]   ;;  %v610_v32 = vsel %vm128_vm2, %v1365_v28, %v605_v29  ;;  %s648_s8 = smov 48  ;;  %1236 = vst.msk [vmem:[%s2649_s1 + $0x40] ss:$8 sm:$0xf] %vm3_vm3, %v1235_v31  }
  0x43   :  { %v1358_v33 = vld [vmem:[%s2648_s0 + $0x6] ss:$16 sm:%s574_s14]   ;;  %1237 = vst.msk [vmem:[%s2649_s1 + $0x21] ss:$8 sm:$0xf0] %vm3_vm3, %v1235_v31   ;;  %611 = vrot.lane.b32.xlu1 %v610_v32, %s1500_s25  ;;  %s837_s14 = smov 192 }
  0x44   :  { %v1359_v34 = vld [vmem:[%s2648_s0 + $0x6] ss:$16 sm:%s579_s15]   ;;  %v577_v35 = vsel %vm118_vm0, %v1358_v33, %v1357_v30  ;;  %s617_s15 = smov 3  ;;  %v1238_v37 = vld [vmem:[%s2648_s0 + $0x120] ss:$4 sm:$0xff]   ;;  %s882_s10 = smov 192 }
  0x45   :  { %v1360_v36 = vld [vmem:[%s2648_s0 + $0x6] ss:$16 sm:%s584_s24]   ;;  %v582_v38 = vsel %vm123_vm1, %v1359_v34, %v577_v35  ;;  %1239 = vst.msk [vmem:[%s2649_s1 + $0x42] ss:$8 sm:$0xf] %vm3_vm3, %v1238_v37   ;;  %s855_s19 = smov 48 }
  0x46   :  { %v1372_v39 = vld [vmem:[%s2648_s0 + $0x186] ss:$16 sm:%s640_s28]   ;;  %1240 = vst.msk [vmem:[%s2649_s1 + $0x23] ss:$8 sm:$0xf0] %vm3_vm3, %v1238_v37   ;;  %v587_v41 = vsel %vm128_vm2, %v1360_v36, %v582_v38  ;;  %s763_s28 = smov 48 }
  0x47   :  { %v1373_v40 = vld [vmem:[%s2648_s0 + $0x186] ss:$16 sm:%s643_s29]   ;;  %588 = vrot.lane.b32.xlu0 %v587_v41, %s1500_s25  ;;  %v1241_v47 = vld [vmem:[%s2648_s0 + $0x140] ss:$4 sm:$0xff]   ;;  %s814_s29 = smov 192  ;;  %s860_s24 = smov 192 }
  0x48   :  { %v646_v42 = vsel %vm118_vm0, %v1373_v40, %v1372_v39  ;;  %v1374_v43 = vld [vmem:[%s2648_s0 + $0x186] ss:$16 sm:%s648_s8]   ;;  %s686_s8 = smov 3  ;;  %1242 = vst.msk [vmem:[%s2649_s1 + $0x44] ss:$8 sm:$0xf] %vm3_vm3, %v1241_v47  }
  0x49   :  { %v1375_v44 = vld [vmem:[%s2648_s0 + $0x186] ss:$16 sm:%s653_s9]   ;;  %v651_v45 = vsel %vm123_vm1, %v1374_v43, %v646_v42  ;;  %s689_s9 = smov 12  ;;  %1243 = vst.msk [vmem:[%s2649_s1 + $0x25] ss:$8 sm:$0xf0] %vm3_vm3, %v1241_v47  }
  0x4a   :  { %v1367_v46 = vld [vmem:[%s2648_s0 + $0x106] ss:$16 sm:%s617_s15]   ;;  %v656_v48 = vsel %vm128_vm2, %v1375_v44, %v651_v45  ;;  %s694_s15 = smov 48  ;;  %v1244_v53 = vld [vmem:[%s2648_s0 + $0x160] ss:$4 sm:$0xff]   ;;  %s928_s5 = smov 192 }
  0x4b   :  { %v1368_v49 = vld [vmem:[%s2648_s0 + $0x106] ss:$16 sm:%s620_s22]   ;;  %657 = vrot.lane.b32.xlu1 %v656_v48, %s1500_s25  ;;  %1245 = vst.msk [vmem:[%s2649_s1 + $0x46] ss:$8 sm:$0xf] %vm3_vm3, %v1244_v53   ;;  %s745_s22 = smov 192 }
  0x4c   :  { %v1369_v50 = vld [vmem:[%s2648_s0 + $0x106] ss:$16 sm:%s625_s23]   ;;  %v623_v51 = vsel %vm118_vm0, %v1368_v49, %v1367_v46  ;;  %s663_s23 = smov 3  ;;  %v1382_v55 = vld [vmem:[%s2648_s0 + $0x8a] ss:$16 sm:%s686_s8]   ;;  %s824_s8 = smov 3 }
  0x4d   :  { %v1370_v52 = vld [vmem:[%s2648_s0 + $0x106] ss:$16 sm:%s630_s4]   ;;  %v628_v54 = vsel %vm123_vm1, %v1369_v50, %v623_v51  ;;  %v1383_v56 = vld [vmem:[%s2648_s0 + $0x8a] ss:$16 sm:%s689_s9]   ;;  %s722_s9 = smov 192  ;;  %s768_s4 = smov 192 }
  0x4e   :  { %1246 = vst.msk [vmem:[%s2649_s1 + $0x27] ss:$8 sm:$0xf0] %vm3_vm3, %v1244_v53   ;;  %v633_v57 = vsel %vm128_vm2, %v1370_v52, %v628_v54  ;;  %v692_v58 = vsel %vm118_vm0, %v1383_v56, %v1382_v55  ;;  %v1384_v59 = vld [vmem:[%s2648_s0 + $0x8a] ss:$16 sm:%s694_s15]   ;;  %s732_s15 = smov 3 }
  0x4f   :  { %v1385_v60 = vld [vmem:[%s2648_s0 + $0x8a] ss:$16 sm:%s699_s16]   ;;  %634 = vrot.lane.b32.xlu0 %v633_v57, %s1500_s25  ;;  %v697_v61 = vsel %vm123_vm1, %v1384_v59, %v692_v58  ;;  %s735_s16 = smov 12  ;;  %s1501_s7 = smov 32  }
  0x50   :  { %v1377_v62 = vld [vmem:[%s2648_s0 + $0xa] ss:$16 sm:%s663_s23]   ;;  %v702_v63 = vsel %vm128_vm2, %v1385_v60, %v697_v61  ;;  %v1402_v19 = vld [vmem:[%s2648_s0 + $0x8e] ss:$16 sm:%s778_s11]   ;;  %s809_s23 = smov 48  ;;  %s905_s20 = smov 192 }
  0x51   :  { %v1378_v0 = vld [vmem:[%s2648_s0 + $0xa] ss:$16 sm:%s666_s2]   ;;  %703 = vrot.lane.b32.xlu1 %v702_v63, %s1500_s25  ;;  %s712_s2 = smov 12  ;;  %s974_s30 = smov 192 }
  0x52   :  { %v1379_v1 = vld [vmem:[%s2648_s0 + $0xa] ss:$16 sm:%s671_s3]   ;;  %v669_v2 = vsel %vm118_vm0, %v1378_v0, %v1377_v62  ;;  %s717_s3 = smov 48  ;;  %v1404_v23 = vld [vmem:[%s2648_s0 + $0x8e] ss:$16 sm:%s786_s17]   ;;  %s801_s17 = smov 3 }
  0x53   :  { %v1380_v3 = vld [vmem:[%s2648_s0 + $0xa] ss:$16 sm:%s676_s12]   ;;  %v674_v4 = vsel %vm123_vm1, %v1379_v1, %v669_v2  ;;  %s781_s12 = smov 12  ;;  %v1405_v24 = vld [vmem:[%s2648_s0 + $0x8e] ss:$16 sm:%s791_s18]   ;;  %s850_s18 = smov 12 }
  0x54   :  { %v1392_v5 = vld [vmem:[%s2648_s0 + $0x18a] ss:$16 sm:%s732_s15]   ;;  %v679_v7 = vsel %vm128_vm2, %v1380_v3, %v674_v4  ;;  %v1403_v20 = vld [vmem:[%s2648_s0 + $0x8e] ss:$16 sm:%s781_s12]   ;;  %s900_s15 = smov 48  ;;  %s946_s11 = smov 48 }
  0x55   :  { %v1393_v6 = vld [vmem:[%s2648_s0 + $0x18a] ss:$16 sm:%s735_s16]   ;;  %680 = vrot.lane.b32.xlu0 %v679_v7, %s1500_s25  ;;  %v784_v22 = vsel %vm118_vm0, %v1403_v20, %v1402_v19  ;;  %s951_s16 = smov 192  ;;  %s997_s12 = smov 192 }
  0x56   :  { %v738_v8 = vsel %vm118_vm0, %v1393_v6, %v1392_v5  ;;  %v1394_v9 = vld [vmem:[%s2648_s0 + $0x18a] ss:$16 sm:%s740_s21]   ;;  %s755_s21 = smov 3  ;;  %v789_v25 = vsel %vm123_vm1, %v1404_v23, %v784_v22  ;;  %v1398_v28 = vld [vmem:[%s2648_s0 + $0xe] ss:$16 sm:%s758_s27]   ;;  %s915_s27 = smov 3 }
  0x57   :  { %v1395_v10 = vld [vmem:[%s2648_s0 + $0x18a] ss:$16 sm:%s745_s22]   ;;  %v743_v11 = vsel %vm123_vm1, %v1394_v9, %v738_v8  ;;  %v1397_v26 = vld [vmem:[%s2648_s0 + $0xe] ss:$16 sm:%s755_s21]   ;;  %v794_v27 = vsel %vm128_vm2, %v1405_v24, %v789_v25  ;;  %s804_s22 = smov 12  ;;  %s1061_s21 = smov 48 }
  0x58   :  { %v1387_v12 = vld [vmem:[%s2648_s0 + $0x10a] ss:$16 sm:%s709_s26]   ;;  %v748_v13 = vsel %vm128_vm2, %v1395_v10, %v743_v11  ;;  %v1399_v29 = vld [vmem:[%s2648_s0 + $0xe] ss:$16 sm:%s763_s28]   ;;  %v761_v30 = vsel %vm118_vm0, %v1398_v28, %v1397_v26  ;;  %s918_s28 = smov 12  ;;  %s1020_s26 = smov 192 }
  0x59   :  { %v1388_v14 = vld [vmem:[%s2648_s0 + $0x10a] ss:$16 sm:%s712_s2]   ;;  %749 = vrot.lane.b32.xlu1 %v748_v13, %s1500_s25  ;;  %v766_v32 = vsel %vm123_vm1, %v1399_v29, %v761_v30  ;;  %s1038_s2 = smov 48 }
  0x5a   :  { %v1389_v15 = vld [vmem:[%s2648_s0 + $0x10a] ss:$16 sm:%s717_s3]   ;;  %v715_v16 = vsel %vm118_vm0, %v1388_v14, %v1387_v12  ;;  %v1400_v31 = vld [vmem:[%s2648_s0 + $0xe] ss:$16 sm:%s768_s4]   ;;  %s869_s3 = smov 3  ;;  %s872_s4 = smov 12 }
  0x5b   :  { %v1390_v17 = vld [vmem:[%s2648_s0 + $0x10a] ss:$16 sm:%s722_s9]   ;;  %v720_v18 = vsel %vm123_vm1, %v1389_v15, %v715_v16  ;;  %s827_s9 = smov 12  ;;  %v1412_v33 = vld [vmem:[%s2648_s0 + $0x18e] ss:$16 sm:%s824_s8]   ;;  %v771_v35 = vsel %vm128_vm2, %v1400_v31, %v766_v32  ;;  %s992_s8 = smov 48 }
  0x5c   :  { %v725_v21 = vsel %vm128_vm2, %v1390_v17, %v720_v18  ;;  %v1413_v34 = vld [vmem:[%s2648_s0 + $0x18e] ss:$16 sm:%s827_s9]   ;;  %v1421_v47 = vld [vmem:[%s2648_s0 + $0x81] ss:$16 sm:%s869_s3]   ;;  %s1043_s9 = smov 192  ;;  %s1089_s3 = smov 192 }
  0x5d   :  { %726 = vrot.lane.b32.xlu0 %v725_v21, %s1500_s25  ;;  %795 = vrot.lane.b32.xlu1 %v794_v27, %s1500_s25  ;;  %v830_v36 = vsel %vm118_vm0, %v1413_v34, %v1412_v33  ;;  %v1414_v37 = vld [vmem:[%s2648_s0 + $0x18e] ss:$16 sm:%s832_s13]   ;;  %s847_s13 = smov 3 }
  0x5e   :  { %v1415_v38 = vld [vmem:[%s2648_s0 + $0x18e] ss:$16 sm:%s837_s14]   ;;  %v835_v39 = vsel %vm123_vm1, %v1414_v37, %v830_v36  ;;  %v1422_v48 = vld [vmem:[%s2648_s0 + $0x81] ss:$16 sm:%s872_s4]   ;;  %s923_s4 = smov 48  ;;  %s895_s14 = smov 12 }
  0x5f   :  { %v1407_v40 = vld [vmem:[%s2648_s0 + $0x10e] ss:$16 sm:%s801_s17]   ;;  %v840_v41 = vsel %vm128_vm2, %v1415_v38, %v835_v39  ;;  %v875_v50 = vsel %vm118_vm0, %v1422_v48, %v1421_v47  ;;  %v1423_v51 = vld [vmem:[%s2648_s0 + $0x81] ss:$16 sm:%s877_s6]   ;;  %s892_s6 = smov 3  ;;  %s1107_s17 = smov 48 }
  0x60   :  { %v1408_v42 = vld [vmem:[%s2648_s0 + $0x10e] ss:$16 sm:%s804_s22]   ;;  %v1424_v52 = vld [vmem:[%s2648_s0 + $0x81] ss:$16 sm:%s882_s10]   ;;  %v880_v53 = vsel %vm123_vm1, %v1423_v51, %v875_v50  ;;  %s941_s10 = smov 12  ;;  %s1066_s22 = smov 192 }
  0x61   :  { %772 = vrot.lane.b32.xlu0 %v771_v35, %s1500_s25  ;;  %v1409_v43 = vld [vmem:[%s2648_s0 + $0x10e] ss:$16 sm:%s809_s23]   ;;  %841 = vrot.lane.b32.xlu1 %v840_v41, %s1500_s25  ;;  %v807_v44 = vsel %vm118_vm0, %v1408_v42, %v1407_v40  ;;  %v885_v55 = vsel %vm128_vm2, %v1424_v52, %v880_v53  ;;  %s961_s23 = smov 3 }
  0x62   :  { %v1410_v45 = vld [vmem:[%s2648_s0 + $0x10e] ss:$16 sm:%s814_s29]   ;;  %v812_v46 = vsel %vm123_vm1, %v1409_v43, %v807_v44  ;;  %v1417_v54 = vld [vmem:[%s2648_s0 + $0x1] ss:$16 sm:%s847_s13]   ;;  %s969_s29 = smov 48  ;;  %s1153_s13 = smov 48 }
  0x63   :  { %v817_v49 = vsel %vm128_vm2, %v1410_v45, %v812_v46  ;;  %v1418_v56 = vld [vmem:[%s2648_s0 + $0x1] ss:$16 sm:%s850_s18]   ;;  %v1441_v11 = vld [vmem:[%s2648_s0 + $0x85] ss:$16 sm:%s961_s23]   ;;  %s1112_s18 = smov 192  ;;  %s1130_s23 = smov 48 }
  0x64   :  { %v1419_v57 = vld [vmem:[%s2648_s0 + $0x1] ss:$16 sm:%s855_s19]   ;;  %v853_v58 = vsel %vm118_vm0, %v1418_v56, %v1417_v54  ;;  %v1443_v15 = vld [vmem:[%s2648_s0 + $0x85] ss:$16 sm:%s969_s29]   ;;  %s1007_s19 = smov 3  ;;  %s984_s29 = smov 3 }
  0x65   :  { %818 = vrot.lane.b32.xlu0 %v817_v49, %s1500_s25  ;;  %886 = vrot.lane.b32.xlu1 %v885_v55, %s1501_s7  ;;  %v1420_v59 = vld [vmem:[%s2648_s0 + $0x1] ss:$16 sm:%s860_s24]   ;;  %v858_v60 = vsel %vm123_vm1, %v1419_v57, %v853_v58  ;;  %s964_s24 = smov 12  ;;  %s1015_s25 = smov 48 }
  0x66   :  { %v1431_v61 = vld [vmem:[%s2648_s0 + $0x181] ss:$16 sm:%s915_s27]   ;;  %v863_v63 = vsel %vm128_vm2, %v1420_v59, %v858_v60  ;;  %v1442_v12 = vld [vmem:[%s2648_s0 + $0x85] ss:$16 sm:%s964_s24]   ;;  %s1084_s27 = smov 48  ;;  %s1181_s24 = smov 192 }
  0x67   :  { %v1432_v62 = vld [vmem:[%s2648_s0 + $0x181] ss:$16 sm:%s918_s28]   ;;  %v967_v14 = vsel %vm118_vm0, %v1442_v12, %v1441_v11  ;;  %v1444_v16 = vld [vmem:[%s2648_s0 + $0x85] ss:$16 sm:%s974_s30]   ;;  %s1033_s30 = smov 12  ;;  %s1135_s28 = smov 192 }
  0x68   :  { %v921_v0 = vsel %vm118_vm0, %v1432_v62, %v1431_v61  ;;  %v1433_v1 = vld [vmem:[%s2648_s0 + $0x181] ss:$16 sm:%s923_s4]   ;;  %s938_s4 = smov 3  ;;  %v972_v17 = vsel %vm123_vm1, %v1443_v15, %v967_v14  ;;  %v1437_v20 = vld [vmem:[%s2648_s0 + $0x5] ss:$16 sm:%s941_s10]   ;;  %s1204_s10 = smov 192 }
  0x69   :  { %v1434_v2 = vld [vmem:[%s2648_s0 + $0x181] ss:$16 sm:%s928_s5]   ;;  %864 = vrot.lane.b32.xlu0 %v863_v63, %s1501_s7  ;;  %v926_v3 = vsel %vm123_vm1, %v1433_v1, %v921_v0  ;;  %v977_v19 = vsel %vm128_vm2, %v1444_v16, %v972_v17  ;;  %s987_s5 = smov 12 }
  0x6a   :  { %v1426_v4 = vld [vmem:[%s2648_s0 + $0x101] ss:$16 sm:%s892_s6]   ;;  %v931_v5 = vsel %vm128_vm2, %v1434_v2, %v926_v3  ;;  %v1436_v18 = vld [vmem:[%s2648_s0 + $0x5] ss:$16 sm:%s938_s4]   ;;  %s1199_s6 = smov 48 }
  0x6b   :  { %v1427_v6 = vld [vmem:[%s2648_s0 + $0x101] ss:$16 sm:%s895_s14]   ;;  %932 = vrot.lane.b32.xlu1 %v931_v5, %s1501_s7  ;;  %v944_v22 = vsel %vm118_vm0, %v1437_v20, %v1436_v18  ;;  %s1158_s14 = smov 192 }
  0x6c   :  { %v1428_v7 = vld [vmem:[%s2648_s0 + $0x101] ss:$16 sm:%s900_s15]   ;;  %v898_v8 = vsel %vm118_vm0, %v1427_v6, %v1426_v4  ;;  %v1438_v21 = vld [vmem:[%s2648_s0 + $0x5] ss:$16 sm:%s946_s11]   ;;  %s1053_s15 = smov 3  ;;  %s1099_s11 = smov 3 }
  0x6d   :  { %v1429_v9 = vld [vmem:[%s2648_s0 + $0x101] ss:$16 sm:%s905_s20]   ;;  %v903_v10 = vsel %vm123_vm1, %v1428_v7, %v898_v8  ;;  %s1010_s20 = smov 12  ;;  %v1439_v23 = vld [vmem:[%s2648_s0 + $0x5] ss:$16 sm:%s951_s16]   ;;  %v949_v24 = vsel %vm123_vm1, %v1438_v21, %v944_v22  ;;  %s1056_s16 = smov 12 }
  0x6e   :  { %v908_v13 = vsel %vm128_vm2, %v1429_v9, %v903_v10  ;;  %v1451_v25 = vld [vmem:[%s2648_s0 + $0x185] ss:$16 sm:%s1007_s19]   ;;  %v954_v27 = vsel %vm128_vm2, %v1439_v23, %v949_v24  ;;  %v1461_v39 = vld [vmem:[%s2648_s0 + $0x89] ss:$16 sm:%s1053_s15]   ;;  %s1176_s19 = smov 48 }
  0x6f   :  { %909 = vrot.lane.b32.xlu0 %v908_v13, %s1501_s7  ;;  %978 = vrot.lane.b32.xlu1 %v977_v19, %s1501_s7  ;;  %v1452_v26 = vld [vmem:[%s2648_s0 + $0x185] ss:$16 sm:%s1010_s20]  }
  0x70   :  { %v1013_v28 = vsel %vm118_vm0, %v1452_v26, %v1451_v25  ;;  %v1453_v29 = vld [vmem:[%s2648_s0 + $0x185] ss:$16 sm:%s1015_s25]   ;;  %s1030_s25 = smov 3  ;;  %v1462_v40 = vld [vmem:[%s2648_s0 + $0x89] ss:$16 sm:%s1056_s16]  }
  0x71   :  { %v1454_v30 = vld [vmem:[%s2648_s0 + $0x185] ss:$16 sm:%s1020_s26]   ;;  %v1018_v31 = vsel %vm123_vm1, %v1453_v29, %v1013_v28  ;;  %v1059_v42 = vsel %vm118_vm0, %v1462_v40, %v1461_v39  ;;  %v1463_v43 = vld [vmem:[%s2648_s0 + $0x89] ss:$16 sm:%s1061_s21]   ;;  %s1076_s21 = smov 3  ;;  %s1079_s26 = smov 12 }
  0x72   :  { %v1446_v32 = vld [vmem:[%s2648_s0 + $0x105] ss:$16 sm:%s984_s29]   ;;  %v1023_v33 = vsel %vm128_vm2, %v1454_v30, %v1018_v31  ;;  %v1464_v44 = vld [vmem:[%s2648_s0 + $0x89] ss:$16 sm:%s1066_s22]   ;;  %v1064_v45 = vsel %vm123_vm1, %v1463_v43, %v1059_v42  ;;  %s1125_s22 = smov 12 }
  0x73   :  { %955 = vrot.lane.b32.xlu0 %v954_v27, %s1501_s7  ;;  %v1447_v34 = vld [vmem:[%s2648_s0 + $0x105] ss:$16 sm:%s987_s5]   ;;  %1024 = vrot.lane.b32.xlu1 %v1023_v33, %s1501_s7  ;;  %v1069_v47 = vsel %vm128_vm2, %v1464_v44, %v1064_v45 }
  0x74   :  { %v1448_v35 = vld [vmem:[%s2648_s0 + $0x105] ss:$16 sm:%s992_s8]   ;;  %v990_v36 = vsel %vm118_vm0, %v1447_v34, %v1446_v32  ;;  %v1456_v46 = vld [vmem:[%s2648_s0 + $0x9] ss:$16 sm:%s1030_s25]   ;;  %s1145_s8 = smov 3 }
  0x75   :  { %v1449_v37 = vld [vmem:[%s2648_s0 + $0x105] ss:$16 sm:%s997_s12]   ;;  %v995_v38 = vsel %vm123_vm1, %v1448_v35, %v990_v36  ;;  %s1102_s12 = smov 12  ;;  %v1457_v48 = vld [vmem:[%s2648_s0 + $0x9] ss:$16 sm:%s1033_s30]  }
  0x76   :  { %v1000_v41 = vsel %vm128_vm2, %v1449_v37, %v995_v38  ;;  %v1458_v49 = vld [vmem:[%s2648_s0 + $0x9] ss:$16 sm:%s1038_s2]   ;;  %v1036_v50 = vsel %vm118_vm0, %v1457_v48, %v1456_v46  ;;  %v1481_v3 = vld [vmem:[%s2648_s0 + $0x8d] ss:$16 sm:%s1145_s8]   ;;  %s1191_s2 = smov 3 }
  0x77   :  { %1001 = vrot.lane.b32.xlu0 %v1000_v41, %s1501_s7  ;;  %1070 = vrot.lane.b32.xlu1 %v1069_v47, %s1501_s7  ;;  %v1459_v51 = vld [vmem:[%s2648_s0 + $0x9] ss:$16 sm:%s1043_s9]   ;;  %v1041_v52 = vsel %vm123_vm1, %v1458_v49, %v1036_v50  ;;  %s1148_s9 = smov 12 }
  0x78   :  { %v1471_v53 = vld [vmem:[%s2648_s0 + $0x189] ss:$16 sm:%s1099_s11]   ;;  %v1046_v55 = vsel %vm128_vm2, %v1459_v51, %v1041_v52  ;;  %v1482_v4 = vld [vmem:[%s2648_s0 + $0x8d] ss:$16 sm:%s1148_s9]   ;;  %v176_v30 = vpop.permute.xlu1 %175  }
  0x79   :  { %v1472_v54 = vld [vmem:[%s2648_s0 + $0x189] ss:$16 sm:%s1102_s12]   ;;  %v1151_v6 = vsel %vm118_vm0, %v1482_v4, %v1481_v3  ;;  %v1483_v7 = vld [vmem:[%s2648_s0 + $0x8d] ss:$16 sm:%s1153_s13]   ;;  %s1168_s13 = smov 3 }
  0x7a   :  { %v1105_v56 = vsel %vm118_vm0, %v1472_v54, %v1471_v53  ;;  %v1473_v57 = vld [vmem:[%s2648_s0 + $0x189] ss:$16 sm:%s1107_s17]   ;;  %s1122_s17 = smov 3  ;;  %v1484_v8 = vld [vmem:[%s2648_s0 + $0x8d] ss:$16 sm:%s1158_s14]   ;;  %v1156_v9 = vsel %vm123_vm1, %v1483_v7, %v1151_v6 }
  0x7b   :  { %v1474_v58 = vld [vmem:[%s2648_s0 + $0x189] ss:$16 sm:%s1112_s18]   ;;  %1047 = vrot.lane.b32.xlu0 %v1046_v55, %s1501_s7  ;;  %v1110_v59 = vsel %vm123_vm1, %v1473_v57, %v1105_v56  ;;  %v1161_v11 = vsel %vm128_vm2, %v1484_v8, %v1156_v9  ;;  %s1171_s18 = smov 12  ;;  %1272 = vst.msk [vmem:[%s2649_s1 + $0x40] sm:$0xff] %vm132_vm4, %v176_v30  }
  0x7c   :  { %v1466_v60 = vld [vmem:[%s2648_s0 + $0x109] ss:$16 sm:%s1076_s21]   ;;  %v1115_v61 = vsel %vm128_vm2, %v1474_v58, %v1110_v59  ;;  %v1476_v10 = vld [vmem:[%s2648_s0 + $0xd] ss:$16 sm:%s1122_s17]   ;;  %v131_v33 = vpop.permute.xlu0 %130  }
  0x7d   :  { %v1467_v62 = vld [vmem:[%s2648_s0 + $0x109] ss:$16 sm:%s1079_s26]   ;;  %1116 = vrot.lane.b32.xlu1 %v1115_v61, %s1501_s7  ;;  %133 = vst.msk [vmem:[%s2649_s1] sm:$0xff] %vm132_vm4, %v131_v33  }
  0x7e   :  { %v1468_v63 = vld [vmem:[%s2648_s0 + $0x109] ss:$16 sm:%s1084_s27]   ;;  %v1082_v0 = vsel %vm118_vm0, %v1467_v62, %v1466_v60  ;;  %v1477_v12 = vld [vmem:[%s2648_s0 + $0xd] ss:$16 sm:%s1125_s22]  }
  0x7f   :  { %v1469_v1 = vld [vmem:[%s2648_s0 + $0x109] ss:$16 sm:%s1089_s3]   ;;  %v1087_v2 = vsel %vm123_vm1, %v1468_v63, %v1082_v0  ;;  %s1194_s3 = smov 12  ;;  %v1478_v13 = vld [vmem:[%s2648_s0 + $0xd] ss:$16 sm:%s1130_s23]   ;;  %v1128_v14 = vsel %vm118_vm0, %v1477_v12, %v1476_v10 }
  0x80   :  { %v1092_v5 = vsel %vm128_vm2, %v1469_v1, %v1087_v2  ;;  %v1479_v15 = vld [vmem:[%s2648_s0 + $0xd] ss:$16 sm:%s1135_s28]   ;;  %v1133_v16 = vsel %vm123_vm1, %v1478_v13, %v1128_v14  ;;  %v199_v34 = vpop.permute.xlu1 %198  }
  0x81   :  { %1093 = vrot.lane.b32.xlu0 %v1092_v5, %s1501_s7  ;;  %1162 = vrot.lane.b32.xlu1 %v1161_v11, %s1501_s7  ;;  %v1491_v17 = vld [vmem:[%s2648_s0 + $0x18d] ss:$16 sm:%s1191_s2]   ;;  %v1138_v19 = vsel %vm128_vm2, %v1479_v15, %v1133_v16 }
  0x82   :  { %v1492_v18 = vld [vmem:[%s2648_s0 + $0x18d] ss:$16 sm:%s1194_s3]   ;;  %1277 = vst.msk [vmem:[%s2649_s1 + $0x60] sm:$0xff] %vm132_vm4, %v199_v34  }
  0x83   :  { %v1197_v20 = vsel %vm118_vm0, %v1492_v18, %v1491_v17  ;;  %v1493_v21 = vld [vmem:[%s2648_s0 + $0x18d] ss:$16 sm:%s1199_s6]  }
  0x84   :  { %v1494_v22 = vld [vmem:[%s2648_s0 + $0x18d] ss:$16 sm:%s1204_s10]   ;;  %v1202_v23 = vsel %vm123_vm1, %v1493_v21, %v1197_v20  ;;  %v153_v35 = vpop.permute.xlu0 %152   ;;  %v245_v36 = vpop.permute.xlu1 %244  }
  0x85   :  { %1139 = vrot.lane.b32.xlu0 %v1138_v19, %s1501_s7  ;;  %v1486_v24 = vld [vmem:[%s2648_s0 + $0x10d] ss:$16 sm:%s1168_s13]   ;;  %v1207_v25 = vsel %vm128_vm2, %v1494_v22, %v1202_v23  ;;  %1267 = vst.msk [vmem:[%s2649_s1 + $0x20] sm:$0xff] %vm132_vm4, %v153_v35  }
  0x86   :  { %v1487_v26 = vld [vmem:[%s2648_s0 + $0x10d] ss:$16 sm:%s1171_s18]   ;;  %1208 = vrot.lane.b32.xlu1 %v1207_v25, %s1501_s7  ;;  %1287 = vst.msk [vmem:[%s2649_s1 + $0x28] sm:$0xff] %vm132_vm4, %v245_v36  }
  0x87   :  { %v1488_v27 = vld [vmem:[%s2648_s0 + $0x10d] ss:$16 sm:%s1176_s19]   ;;  %v1174_v28 = vsel %vm118_vm0, %v1487_v26, %v1486_v24 }
  0x88   :  { %v1489_v29 = vld [vmem:[%s2648_s0 + $0x10d] ss:$16 sm:%s1181_s24]   ;;  %v1179_v31 = vsel %vm123_vm1, %v1488_v27, %v1174_v28  ;;  %v222_v37 = vpop.permute.xlu0 %221  }
  0x89   :  { %v1184_v32 = vsel %vm128_vm2, %v1489_v29, %v1179_v31  ;;  %1282 = vst.msk [vmem:[%s2649_s1 + $0x8] sm:$0xff] %vm132_vm4, %v222_v37  }
  0x8a   :  { %1185 = vrot.lane.b32.xlu0 %v1184_v32, %s1501_s7  ;;  %v291_v38 = vpop.permute.xlu1 %290  }
  0x8b   :  { %1297 = vst.msk [vmem:[%s2649_s1 + $0x68] sm:$0xff] %vm132_vm4, %v291_v38  }
  0x8e   :  { %v268_v39 = vpop.permute.xlu0 %267   ;;  %v337_v40 = vpop.permute.xlu1 %336  }
  0x8f   :  { %1292 = vst.msk [vmem:[%s2649_s1 + $0x48] sm:$0xff] %vm132_vm4, %v268_v39   ;;  %1307 = vst.msk [vmem:[%s2649_s1 + $0x30] sm:$0xff] %vm132_vm4, %v337_v40  }
  0x92   :  { %v314_v41 = vpop.permute.xlu0 %313  }
  0x93   :  { %1302 = vst.msk [vmem:[%s2649_s1 + $0x10] sm:$0xff] %vm132_vm4, %v314_v41  }
  0x95   :  { %v383_v42 = vpop.permute.xlu1 %382  }
  0x96   :  { %1317 = vst.msk [vmem:[%s2649_s1 + $0x70] sm:$0xff] %vm132_vm4, %v383_v42  }
  0x99   :  { %v360_v43 = vpop.permute.xlu0 %359   ;;  %v429_v44 = vpop.permute.xlu1 %428  }
  0x9a   :  { %1312 = vst.msk [vmem:[%s2649_s1 + $0x50] sm:$0xff] %vm132_vm4, %v360_v43   ;;  %1327 = vst.msk [vmem:[%s2649_s1 + $0x38] sm:$0xff] %vm132_vm4, %v429_v44  }
  0x9d   :  { %v406_v45 = vpop.permute.xlu0 %405  }
  0x9e   :  { %1322 = vst.msk [vmem:[%s2649_s1 + $0x18] sm:$0xff] %vm132_vm4, %v406_v45  }
  0xa1   :  { %v475_v46 = vpop.permute.xlu1 %474  }
  0xa2   :  { %1337 = vst.msk [vmem:[%s2649_s1 + $0x78] sm:$0xff] %vm132_vm4, %v475_v46  }
  0xa5   :  { %v452_v47 = vpop.permute.xlu0 %451  }
  0xa6   :  { %1332 = vst.msk [vmem:[%s2649_s1 + $0x58] sm:$0xff] %vm132_vm4, %v452_v47  }
  0xa7   :  { %v520_v48 = vpop.permute.xlu1 %519  }
  0xa8   :  { %1346 = vst.msk [vmem:[%s2649_s1 + $0x20] sm:$0xff] %vm499_vm5, %v520_v48  }
  0xab   :  { %v498_v49 = vpop.permute.xlu0 %497  }
  0xac   :  { %500 = vst.msk [vmem:[%s2649_s1] sm:$0xff] %vm499_vm5, %v498_v49  }
  0xaf   :  { %v566_v50 = vpop.permute.xlu1 %565  }
  0xb0   :  { %1356 = vst.msk [vmem:[%s2649_s1 + $0x60] sm:$0xff] %vm499_vm5, %v566_v50  }
  0xb3   :  { %v543_v51 = vpop.permute.xlu0 %542  }
  0xb4   :  { %1351 = vst.msk [vmem:[%s2649_s1 + $0x40] sm:$0xff] %vm499_vm5, %v543_v51  }
  0xb5   :  { %v612_v52 = vpop.permute.xlu1 %611  }
  0xb6   :  { %1366 = vst.msk [vmem:[%s2649_s1 + $0x28] sm:$0xff] %vm499_vm5, %v612_v52  }
  0xb9   :  { %v589_v53 = vpop.permute.xlu0 %588  }
  0xba   :  { %1361 = vst.msk [vmem:[%s2649_s1 + $0x8] sm:$0xff] %vm499_vm5, %v589_v53  }
  0xbd   :  { %v658_v54 = vpop.permute.xlu1 %657  }
  0xbe   :  { %1376 = vst.msk [vmem:[%s2649_s1 + $0x68] sm:$0xff] %vm499_vm5, %v658_v54  }
  0xc1   :  { %v635_v55 = vpop.permute.xlu0 %634  }
  0xc2   :  { %1371 = vst.msk [vmem:[%s2649_s1 + $0x48] sm:$0xff] %vm499_vm5, %v635_v55  }
  0xc3   :  { %v704_v56 = vpop.permute.xlu1 %703  }
  0xc4   :  { %1386 = vst.msk [vmem:[%s2649_s1 + $0x30] sm:$0xff] %vm499_vm5, %v704_v56  }
  0xc7   :  { %v681_v57 = vpop.permute.xlu0 %680  }
  0xc8   :  { %1381 = vst.msk [vmem:[%s2649_s1 + $0x10] sm:$0xff] %vm499_vm5, %v681_v57  }
  0xcb   :  { %v750_v58 = vpop.permute.xlu1 %749  }
  0xcc   :  { %1396 = vst.msk [vmem:[%s2649_s1 + $0x70] sm:$0xff] %vm499_vm5, %v750_v58  }
  0xcf   :  { %v727_v59 = vpop.permute.xlu0 %726   ;;  %v796_v60 = vpop.permute.xlu1 %795  }
  0xd0   :  { %1391 = vst.msk [vmem:[%s2649_s1 + $0x50] sm:$0xff] %vm499_vm5, %v727_v59   ;;  %1406 = vst.msk [vmem:[%s2649_s1 + $0x38] sm:$0xff] %vm499_vm5, %v796_v60  }
  0xd3   :  { %v773_v61 = vpop.permute.xlu0 %772   ;;  %v842_v62 = vpop.permute.xlu1 %841  }
  0xd4   :  { %1401 = vst.msk [vmem:[%s2649_s1 + $0x18] sm:$0xff] %vm499_vm5, %v773_v61   ;;  %1416 = vst.msk [vmem:[%s2649_s1 + $0x78] sm:$0xff] %vm499_vm5, %v842_v62  }
  0xd7   :  { %v819_v63 = vpop.permute.xlu0 %818   ;;  %v887_v0 = vpop.permute.xlu1 %886  }
  0xd8   :  { %1411 = vst.msk [vmem:[%s2649_s1 + $0x58] sm:$0xff] %vm499_vm5, %v819_v63  }
  0xd9   :  { %1425 = vst.msk [vmem:[%s2649_s1 + $0x20] sm:$0xff] %vm866_vm6, %v887_v0  }
  0xdb   :  { %v865_v1 = vpop.permute.xlu0 %864  }
  0xdc   :  { %867 = vst.msk [vmem:[%s2649_s1] sm:$0xff] %vm866_vm6, %v865_v1  }
  0xdd   :  { %v933_v2 = vpop.permute.xlu1 %932  }
  0xde   :  { %1435 = vst.msk [vmem:[%s2649_s1 + $0x60] sm:$0xff] %vm866_vm6, %v933_v2  }
  0xe1   :  { %v910_v3 = vpop.permute.xlu0 %909   ;;  %v979_v4 = vpop.permute.xlu1 %978  }
  0xe2   :  { %1430 = vst.msk [vmem:[%s2649_s1 + $0x40] sm:$0xff] %vm866_vm6, %v910_v3   ;;  %1445 = vst.msk [vmem:[%s2649_s1 + $0x28] sm:$0xff] %vm866_vm6, %v979_v4  }
  0xe5   :  { %v956_v5 = vpop.permute.xlu0 %955   ;;  %v1025_v6 = vpop.permute.xlu1 %1024  }
  0xe6   :  { %1440 = vst.msk [vmem:[%s2649_s1 + $0x8] sm:$0xff] %vm866_vm6, %v956_v5   ;;  %1455 = vst.msk [vmem:[%s2649_s1 + $0x68] sm:$0xff] %vm866_vm6, %v1025_v6  }
  0xe9   :  { %v1002_v7 = vpop.permute.xlu0 %1001   ;;  %v1071_v8 = vpop.permute.xlu1 %1070  }
  0xea   :  { %1450 = vst.msk [vmem:[%s2649_s1 + $0x48] sm:$0xff] %vm866_vm6, %v1002_v7   ;;  %1465 = vst.msk [vmem:[%s2649_s1 + $0x30] sm:$0xff] %vm866_vm6, %v1071_v8  }
  0xed   :  { %v1048_v9 = vpop.permute.xlu0 %1047  }
  0xee   :  { %1460 = vst.msk [vmem:[%s2649_s1 + $0x10] sm:$0xff] %vm866_vm6, %v1048_v9  }
  0xef   :  { %v1117_v10 = vpop.permute.xlu1 %1116  }
  0xf0   :  { %1475 = vst.msk [vmem:[%s2649_s1 + $0x70] sm:$0xff] %vm866_vm6, %v1117_v10  }
  0xf3   :  { %v1094_v11 = vpop.permute.xlu0 %1093   ;;  %v1163_v12 = vpop.permute.xlu1 %1162  }
  0xf4   :  { %1470 = vst.msk [vmem:[%s2649_s1 + $0x50] sm:$0xff] %vm866_vm6, %v1094_v11   ;;  %1485 = vst.msk [vmem:[%s2649_s1 + $0x38] sm:$0xff] %vm866_vm6, %v1163_v12  }
  0xf7   :  { %v1140_v13 = vpop.permute.xlu0 %1139  }
  0xf8   :  { %1480 = vst.msk [vmem:[%s2649_s1 + $0x18] sm:$0xff] %vm866_vm6, %v1140_v13   ;;  %v1209_v14 = vpop.permute.xlu1 %1208  }
  0xf9   :  { %1495 = vst.msk [vmem:[%s2649_s1 + $0x78] sm:$0xff] %vm866_vm6, %v1209_v14  }
  0xfc   :  { %v1186_v15 = vpop.permute.xlu0 %1185  }
  0xfd   :  { %1490 = vst.msk [vmem:[%s2649_s1 + $0x58] sm:$0xff] %vm866_vm6, %v1186_v15  }

// kernel: spatial_temporal_embedding.3
= control target key start
LH: loop header
LB: loop body
LE: loop exit
PB: predicated region body
PF: predicated region fallthrough
CT: control target
= control target key end

     0   :  { %v450_v3 = vmov 0.0   ;;  %vm37_vm0 = vcmask 261120   ;;  %v344_v34 = vlaneseq  ;;  %s606_s1 = inlined_call_operand.vmem [shape: f32[32,512], index: 1, kind: input, shape index: {}]   ;;  %s607_s0 = inlined_call_operand.vmem [shape: f32[8,32], index: 0, kind: input, shape index: {}]   ;;  %s608_s2 = inlined_call_operand.vmem [shape: f32[32,512], index: 2, kind: input, shape index: {}]   ;;  %s609_s4 = inlined_call_operand.vmem [shape: f32[1,512], index: 4, kind: input, shape index: {}]   ;;  %s610_s3 = inlined_call_operand.vmem [shape: f32[1,512], index: 3, kind: input, shape index: {}]   ;;  %s611_s5 = inlined_call_operand.vmem [shape: f32[8,512], index: 5, kind: output, shape index: {}]  }
   0x1   :  { %v34_v0 = vld [vmem:[%s606_s1 + $0x68] sm:$0xff]  ;;  %v36_v1 = vld [vmem:[%s606_s1 + $0x78] sm:$0xff]  ;;  %v33_v2 = vld [vmem:[%s606_s1 + $0x60] sm:$0xff]  ;;  %105 = vmatprep.mubr.f32.mxu0 %v450_v3  ;;  %176 = vmatprep.mubr.f32.mxu1 %v450_v3 }
   0x2   :  { %65 = vmatprep.subr.mxu0 %v34_v0  ;;  %136 = vmatprep.subr.mxu1 %v36_v1  ;;  %v35_v4 = vld [vmem:[%s606_s1 + $0x70] sm:$0xff]  ;;  %v30_v5 = vld [vmem:[%s606_s1 + $0x48] sm:$0xff]  ;;  %v32_v6 = vld [vmem:[%s606_s1 + $0x58] sm:$0xff]  ;;  %v345_v35 = vshrl.u32 %v344_v34, 7 }
   0x3   :  { %66 = vmatpush1.msra.mxu0 %v33_v2  ;;  %137 = vmatpush1.msra.mxu1 %v35_v4  ;;  %v29_v7 = vld [vmem:[%s606_s1 + $0x40] sm:$0xff]  ;;  %v31_v8 = vld [vmem:[%s606_s1 + $0x50] sm:$0xff]  ;;  %v26_v9 = vld [vmem:[%s606_s1 + $0x28] sm:$0xff] }
   0x4   :  { %67 = vmatprep.subr.mxu0 %v30_v5  ;;  %138 = vmatprep.subr.mxu1 %v32_v6  ;;  %v28_v10 = vld [vmem:[%s606_s1 + $0x38] sm:$0xff]  ;;  %v25_v11 = vld [vmem:[%s606_s1 + $0x20] sm:$0xff]  ;;  %v27_v12 = vld [vmem:[%s606_s1 + $0x30] sm:$0xff]  ;;  %v346_v39 = vsub.s32 0, %v345_v35  ;;  %v354_v40 = vsub.s32 2, %v345_v35  ;;  %v350_v41 = vsub.s32 1, %v345_v35 }
   0x5   :  { %68 = vmatpush1.msra.mxu0 %v29_v7  ;;  %139 = vmatpush1.msra.mxu1 %v31_v8  ;;  %v22_v13 = vld [vmem:[%s606_s1 + $0x8] sm:$0xff]  ;;  %v24_v14 = vld [vmem:[%s606_s1 + $0x18] sm:$0xff]  ;;  %v21_v15 = vld [vmem:[%s606_s1] sm:$0xff]  ;;  %v358_v42 = vsub.s32 3, %v345_v35 }
   0x6   :  { %69 = vmatprep.subr.mxu0 %v26_v9  ;;  %140 = vmatprep.subr.mxu1 %v28_v10  ;;  %v23_v16 = vld [vmem:[%s606_s1 + $0x10] sm:$0xff]  ;;  %v20_v17 = vld [vmem:[%s607_s0] sm:$0xff]  ;;  %v196_v18 = vld [vmem:[%s608_s2 + $0x68] sm:$0xff] }
   0x7   :  { %70 = vmatpush1.msra.mxu0 %v25_v11  ;;  %141 = vmatpush1.msra.mxu1 %v27_v12  ;;  %v198_v19 = vld [vmem:[%s608_s2 + $0x78] sm:$0xff]  ;;  %v195_v20 = vld [vmem:[%s608_s2 + $0x60] sm:$0xff]  ;;  %v197_v21 = vld [vmem:[%s608_s2 + $0x70] sm:$0xff] }
   0x8   :  { %71 = vmatprep.subr.mxu0 %v22_v13  ;;  %142 = vmatprep.subr.mxu1 %v24_v14  ;;  %v192_v22 = vld [vmem:[%s608_s2 + $0x48] sm:$0xff]  ;;  %v194_v23 = vld [vmem:[%s608_s2 + $0x58] sm:$0xff]  ;;  %v191_v24 = vld [vmem:[%s608_s2 + $0x40] sm:$0xff] }
   0x9   :  { %72 = vmatpush1.msra.mxu0 %v21_v15  ;;  %143 = vmatpush1.msra.mxu1 %v23_v16  ;;  %v193_v25 = vld [vmem:[%s608_s2 + $0x50] sm:$0xff]  ;;  %v188_v26 = vld [vmem:[%s608_s2 + $0x28] sm:$0xff]  ;;  %v190_v27 = vld [vmem:[%s608_s2 + $0x38] sm:$0xff] }
   0xa   :  { %429 = vmatmul.mubr.msk.f32.vlgmr.msra.gmra.mxu0 %vm37_vm0, %v20_v17  ;;  %430 = vmatmul.mubr.msk.f32.vlgmr.msra.gmra.mxu1 %vm37_vm0, %v20_v17  ;;  %v187_v28 = vld [vmem:[%s608_s2 + $0x20] sm:$0xff]  ;;  %v189_v29 = vld [vmem:[%s608_s2 + $0x30] sm:$0xff]  ;;  %v184_v30 = vld [vmem:[%s608_s2 + $0x8] sm:$0xff] }
   0xb   :  { %223 = vmatprep.subr.mxu0 %v196_v18  ;;  %294 = vmatprep.subr.mxu1 %v198_v19  ;;  %v186_v31 = vld [vmem:[%s608_s2 + $0x18] sm:$0xff]  ;;  %v183_v32 = vld [vmem:[%s608_s2] sm:$0xff]  ;;  %v185_v33 = vld [vmem:[%s608_s2 + $0x10] sm:$0xff] }
   0xc   :  { %224 = vmatpush1.msra.mxu0 %v195_v20  ;;  %295 = vmatpush1.msra.mxu1 %v197_v21  ;;  %v342_v38 = vld [vmem:[%s609_s4] sm:$0xf] }
   0xd   :  { %225 = vmatprep.subr.mxu0 %v192_v22  ;;  %296 = vmatprep.subr.mxu1 %v194_v23  ;;  %v347_v43 = vrot.slane %v342_v38, %v346_v39  ;;  %v355_v44 = vrot.slane %v342_v38, %v354_v40  ;;  %v351_v47 = vrot.slane %v342_v38, %v350_v41  ;;  %v341_v5 = vld [vmem:[%s610_s3] sm:$0xf] }
   0xe   :  { %226 = vmatpush1.msra.mxu0 %v191_v24  ;;  %297 = vmatpush1.msra.mxu1 %v193_v25  ;;  %v359_v48 = vrot.slane %v342_v38, %v358_v42  ;;  %v392_v6 = vrot.slane %v341_v5, %v346_v39  ;;  %v400_v7 = vrot.slane %v341_v5, %v354_v40 }
   0xf   :  { %227 = vmatprep.subr.mxu0 %v188_v26  ;;  %298 = vmatprep.subr.mxu1 %v190_v27  ;;  %v396_v8 = vrot.slane %v341_v5, %v350_v41  ;;  %v404_v9 = vrot.slane %v341_v5, %v358_v42 }
  0x10   :  { %228 = vmatpush1.msra.mxu0 %v187_v28  ;;  %299 = vmatpush1.msra.mxu1 %v189_v29 }
  0x11   :  { %229 = vmatprep.subr.mxu0 %v184_v30  ;;  %300 = vmatprep.subr.mxu1 %v186_v31 }
  0x12   :  { %230 = vmatpush1.msra.mxu0 %v183_v32  ;;  %263 = vmatprep.mubr.f32.mxu0 %v450_v3 }
  0x13   :  { %301 = vmatpush1.msra.mxu1 %v185_v33  ;;  %334 = vmatprep.mubr.f32.mxu1 %v450_v3 }
  0x14   :  { %431 = vmatmul.mubr.msk.f32.vlgmr.msra.gmra.mxu0 %vm37_vm0, %v20_v17  ;;  %432 = vmatmul.mubr.msk.f32.vlgmr.msra.gmra.mxu1 %vm37_vm0, %v20_v17 }
  0xca   :  { %v107_v36 = vpop.f32.mrf.mxu0  ;;  %v178_v37 = vpop.f32.mrf.mxu1 }
  0xcb   :  { %v409_v10 = vsub.f32 %v107_v36, %v392_v6  ;;  %v411_v12 = vsub.f32 %v178_v37, %v400_v7 }
  0xcc   :  { %v109_v45 = vpop.f32.mrf.mxu0  ;;  %v180_v46 = vpop.f32.mrf.mxu1 }
  0xcd   :  { %v410_v14 = vsub.f32 %v109_v45, %v396_v8  ;;  %v412_v17 = vsub.f32 %v180_v46, %v404_v9 }
  0xd4   :  { %v265_v49 = vpop.f32.mrf.mxu0  ;;  %v336_v50 = vpop.f32.mrf.mxu1 }
  0xd5   :  { %v364_v51 = vsub.f32 %v347_v43, %v265_v49  ;;  %v366_v52 = vsub.f32 %v355_v44, %v336_v50 }
  0xd6   :  { %v267_v53 = vpop.f32.mrf.mxu0  ;;  %v338_v54 = vpop.f32.mrf.mxu1 }
  0xd7   :  { %v368_v55 = vmul.f32 1.442695, %v364_v51  ;;  %v372_v56 = vmul.f32 1.442695, %v366_v52  ;;  %v365_v57 = vsub.f32 %v351_v47, %v267_v53  ;;  %v367_v58 = vsub.f32 %v359_v48, %v338_v54 }
  0xd9   :  { %434 = vpow2.f32 %v368_v55  ;;  %v370_v59 = vmul.f32 1.442695, %v365_v57  ;;  %v374_v60 = vmul.f32 1.442695, %v367_v58 }
  0xda   :  { %436 = vpow2.f32 %v372_v56 }
  0xdb   :  { %438 = vpow2.f32 %v370_v59 }
  0xdc   :  { %440 = vpow2.f32 %v374_v60 }
  0xe6   :  { %v435_v61 = vpop.eup %434 }
  0xe7   :  { %v437_v62 = vpop.eup %436  ;;  %v376_v63 = vadd.f32 1.0, %v435_v61 }
  0xe8   :  { %v439_v0 = vpop.eup %438  ;;  %v378_v1 = vadd.f32 1.0, %v437_v62 }
  0xe9   :  { %v441_v2 = vpop.eup %440  ;;  %442 = vrcp.f32 %v376_v63  ;;  %v377_v3 = vadd.f32 1.0, %v439_v0 }
  0xea   :  { %444 = vrcp.f32 %v378_v1  ;;  %v379_v4 = vadd.f32 1.0, %v441_v2 }
  0xeb   :  { %446 = vrcp.f32 %v377_v3 }
  0xec   :  { %448 = vrcp.f32 %v379_v4 }
  0xf6   :  { %v443_v11 = vpop.eup %442 }
  0xf7   :  { %v445_v13 = vpop.eup %444  ;;  %v413_v15 = vmul.f32 %v443_v11, %v409_v10 }
  0xf8   :  { %v447_v16 = vpop.eup %446  ;;  %v415_v18 = vmul.f32 %v445_v13, %v411_v12 }
  0xf9   :  { %v449_v19 = vpop.eup %448  ;;  %v417_v20 = vadd.f32 %v413_v15, %v392_v6  ;;  %v414_v21 = vmul.f32 %v447_v16, %v410_v14 }
  0xfa   :  { %v419_v22 = vadd.f32 %v415_v18, %v400_v7  ;;  %v416_v23 = vmul.f32 %v449_v19, %v412_v17 }
  0xfb   :  { %421 = vst [vmem:[%s611_s5] sm:$0xff] %v417_v20  ;;  %v418_v24 = vadd.f32 %v414_v21, %v396_v8 }
  0xfc   :  { %423 = vst [vmem:[%s611_s5 + $0x10] sm:$0xff] %v419_v22  ;;  %v420_v25 = vadd.f32 %v416_v23, %v404_v9 }
  0xfd   :  { %422 = vst [vmem:[%s611_s5 + $0x8] sm:$0xff] %v418_v24 }
  0xfe   :  { %424 = vst [vmem:[%s611_s5 + $0x18] sm:$0xff] %v420_v25 }

// kernel: spatial_temporal_embedding.2
= control target key start
LH: loop header
LB: loop body
LE: loop exit
PB: predicated region body
PF: predicated region fallthrough
CT: control target
= control target key end

     0   :  { %s906_s18 = smov 0   ;;  %s908_s19 = smov 0   ;;  %s1049_s0 = inlined_call_operand.vmem [shape: f32[16,32], index: 0, kind: input, shape index: {}]   ;;  %s1050_s1 = inlined_call_operand.vmem [shape: f32[32,512], index: 1, kind: input, shape index: {}]   ;;  %s1051_s2 = inlined_call_operand.vmem [shape: f32[32,512], index: 2, kind: input, shape index: {}]   ;;  %s1052_s3 = inlined_call_operand.vmem [shape: f32[1,512], index: 3, kind: input, shape index: {}]   ;;  %s1053_s4 = inlined_call_operand.vmem [shape: f32[1,512], index: 4, kind: input, shape index: {}]   ;;  %s1054_s5 = inlined_call_operand.vmem [shape: f32[16,512], index: 5, kind: output, shape index: {}]  }
   0x1   :  { %s910_s20 = smov 0  }
   0x2 LB: > { %s27_s21 = sadd.s32 1, %s869_s19  ;;  %p799_p0 = scmp.ge.s32.totalorder %s873_s20, 1  ;;  %s873_s20 = sphi %s910_s20, %s15_s20   ;;  %s869_s19 = sphi %s908_s19, %s1056_s19   ;;  %s865_s18 = sphi %s906_s18, %s1055_s18  }
   0x3   : > { %p29_p1 = scmp.ge.s32.totalorder %s27_s21, 2  ;;  %p220_p2 = scmp.lt.s32.totalorder %s873_s20, 3 }
   0x5   : > { %s1058_s21 = smov (%p29_p1, %s27_s21), 0  ;;  %p221_p3 = pnand %p799_p0, %p220_p2 }
   0x6   : > { %p259_p4 = scmp.lt.s32.totalorder (!%p221_p3), %s865_s18, 1 }
   0x7   : > { %224 = sbr.rel (%p221_p3) target bundleno = 267 (0x10b), region = 40 }
   0xc   : > { %v297_v0 = vld [vmem:[%s1050_s1 + $0x68] sm:$0xff]  ;;  %v299_v1 = vld [vmem:[%s1050_s1 + $0x78] sm:$0xff]  ;;  %v296_v2 = vld [vmem:[%s1050_s1 + $0x60] sm:$0xff]  ;;  %s1060_s18 = smov (!%p259_p4, %s865_s18), 1  ;;  %vm300_vm0 = vcmask 261120   ;;  %v875_v17 = vmov 0.0   ;;  %v607_v34 = vlaneseq }
   0xd   : > { %328 = vmatprep.subr.mxu0 %v297_v0  ;;  %399 = vmatprep.subr.mxu1 %v299_v1  ;;  %v298_v3 = vld [vmem:[%s1050_s1 + $0x70] sm:$0xff]  ;;  %v293_v4 = vld [vmem:[%s1050_s1 + $0x48] sm:$0xff]  ;;  %v295_v5 = vld [vmem:[%s1050_s1 + $0x58] sm:$0xff]  ;;  %s800_s29 = sshll.u32 %s1060_s18, 3  ;;  %s809_s6 = sshll.u32 %s1060_s18, 5 }
   0xe   : > { %329 = vmatpush1.msra.mxu0 %v296_v2  ;;  %400 = vmatpush1.msra.mxu1 %v298_v3  ;;  %v292_v6 = vld [vmem:[%s1050_s1 + $0x40] sm:$0xff]  ;;  %v294_v7 = vld [vmem:[%s1050_s1 + $0x50] sm:$0xff]  ;;  %v289_v8 = vld [vmem:[%s1050_s1 + $0x28] sm:$0xff]  ;;  %s262_s9 = scalar_lea.vmem %s1049_s0, %s800_s29  ;;  %v608_v35 = vshrl.u32 %v607_v34, 7 }
   0xf   : > { %330 = vmatprep.subr.mxu0 %v293_v4  ;;  %401 = vmatprep.subr.mxu1 %v295_v5  ;;  %v291_v9 = vld [vmem:[%s1050_s1 + $0x38] sm:$0xff]  ;;  %v288_v10 = vld [vmem:[%s1050_s1 + $0x20] sm:$0xff]  ;;  %v290_v11 = vld [vmem:[%s1050_s1 + $0x30] sm:$0xff] }
  0x10   : > { %331 = vmatpush1.msra.mxu0 %v292_v6  ;;  %402 = vmatpush1.msra.mxu1 %v294_v7  ;;  %v285_v12 = vld [vmem:[%s1050_s1 + $0x8] sm:$0xff]  ;;  %v287_v13 = vld [vmem:[%s1050_s1 + $0x18] sm:$0xff]  ;;  %v284_v14 = vld [vmem:[%s1050_s1] sm:$0xff]  ;;  %v609_v39 = vsub.s32 0, %v608_v35  ;;  %v617_v40 = vsub.s32 2, %v608_v35  ;;  %v613_v41 = vsub.s32 1, %v608_v35 }
  0x11   : > { %332 = vmatprep.subr.mxu0 %v289_v8  ;;  %403 = vmatprep.subr.mxu1 %v291_v9  ;;  %v286_v15 = vld [vmem:[%s1050_s1 + $0x10] sm:$0xff]  ;;  %v283_v16 = vld [vmem:[%s262_s9] sm:$0xff]  ;;  %v459_v18 = vld [vmem:[%s1051_s2 + $0x68] sm:$0xff]  ;;  %v621_v42 = vsub.s32 3, %v608_v35  ;;  %s281_s9 = scalar_lea.vmem %s1054_s5, %s809_s6 }
  0x12   : > { %333 = vmatpush1.msra.mxu0 %v288_v10  ;;  %404 = vmatpush1.msra.mxu1 %v290_v11  ;;  %v461_v19 = vld [vmem:[%s1051_s2 + $0x78] sm:$0xff]  ;;  %v458_v20 = vld [vmem:[%s1051_s2 + $0x60] sm:$0xff]  ;;  %v460_v21 = vld [vmem:[%s1051_s2 + $0x70] sm:$0xff] }
  0x13   : > { %334 = vmatprep.subr.mxu0 %v285_v12  ;;  %405 = vmatprep.subr.mxu1 %v287_v13  ;;  %v455_v22 = vld [vmem:[%s1051_s2 + $0x48] sm:$0xff]  ;;  %v457_v23 = vld [vmem:[%s1051_s2 + $0x58] sm:$0xff]  ;;  %v454_v24 = vld [vmem:[%s1051_s2 + $0x40] sm:$0xff] }
  0x14   : > { %335 = vmatpush1.msra.mxu0 %v284_v14  ;;  %368 = vmatprep.mubr.f32.mxu0 %v875_v17  ;;  %v456_v25 = vld [vmem:[%s1051_s2 + $0x50] sm:$0xff]  ;;  %v451_v26 = vld [vmem:[%s1051_s2 + $0x28] sm:$0xff]  ;;  %v453_v27 = vld [vmem:[%s1051_s2 + $0x38] sm:$0xff] }
  0x15   : > { %406 = vmatpush1.msra.mxu1 %v286_v15  ;;  %439 = vmatprep.mubr.f32.mxu1 %v875_v17  ;;  %v450_v28 = vld [vmem:[%s1051_s2 + $0x20] sm:$0xff]  ;;  %v452_v29 = vld [vmem:[%s1051_s2 + $0x30] sm:$0xff]  ;;  %v447_v30 = vld [vmem:[%s1051_s2 + $0x8] sm:$0xff] }
  0x16   : > { %803 = vmatmul.mubr.msk.f32.vlgmr.msra.gmra.mxu0 %vm300_vm0, %v283_v16  ;;  %804 = vmatmul.mubr.msk.f32.vlgmr.msra.gmra.mxu1 %vm300_vm0, %v283_v16  ;;  %v449_v31 = vld [vmem:[%s1051_s2 + $0x18] sm:$0xff]  ;;  %v446_v32 = vld [vmem:[%s1051_s2] sm:$0xff]  ;;  %v448_v33 = vld [vmem:[%s1051_s2 + $0x10] sm:$0xff] }
  0x17   : > { %486 = vmatprep.subr.mxu0 %v459_v18  ;;  %557 = vmatprep.subr.mxu1 %v461_v19  ;;  %v605_v38 = vld [vmem:[%s1053_s4] sm:$0xf] }
  0x18   : > { %487 = vmatpush1.msra.mxu0 %v458_v20  ;;  %558 = vmatpush1.msra.mxu1 %v460_v21  ;;  %v610_v43 = vrot.slane %v605_v38, %v609_v39  ;;  %v618_v44 = vrot.slane %v605_v38, %v617_v40  ;;  %v614_v47 = vrot.slane %v605_v38, %v613_v41  ;;  %v604_v5 = vld [vmem:[%s1052_s3] sm:$0xf] }
  0x19   : > { %488 = vmatprep.subr.mxu0 %v455_v22  ;;  %559 = vmatprep.subr.mxu1 %v457_v23  ;;  %v622_v48 = vrot.slane %v605_v38, %v621_v42  ;;  %v655_v6 = vrot.slane %v604_v5, %v609_v39  ;;  %v663_v7 = vrot.slane %v604_v5, %v617_v40 }
  0x1a   : > { %489 = vmatpush1.msra.mxu0 %v454_v24  ;;  %560 = vmatpush1.msra.mxu1 %v456_v25  ;;  %v659_v8 = vrot.slane %v604_v5, %v613_v41  ;;  %v667_v9 = vrot.slane %v604_v5, %v621_v42 }
  0x1b   : > { %490 = vmatprep.subr.mxu0 %v451_v26  ;;  %561 = vmatprep.subr.mxu1 %v453_v27 }
  0x1c   : > { %491 = vmatpush1.msra.mxu0 %v450_v28  ;;  %562 = vmatpush1.msra.mxu1 %v452_v29 }
  0x1d   : > { %492 = vmatprep.subr.mxu0 %v447_v30  ;;  %563 = vmatprep.subr.mxu1 %v449_v31 }
  0x1e   : > { %493 = vmatpush1.msra.mxu0 %v446_v32  ;;  %526 = vmatprep.mubr.f32.mxu0 %v875_v17 }
  0x1f   : > { %564 = vmatpush1.msra.mxu1 %v448_v33  ;;  %597 = vmatprep.mubr.f32.mxu1 %v875_v17 }
  0x20   : > { %805 = vmatmul.mubr.msk.f32.vlgmr.msra.gmra.mxu0 %vm300_vm0, %v283_v16  ;;  %806 = vmatmul.mubr.msk.f32.vlgmr.msra.gmra.mxu1 %vm300_vm0, %v283_v16 }
  0xd6   : > { %v370_v36 = vpop.f32.mrf.mxu0  ;;  %v441_v37 = vpop.f32.mrf.mxu1 }
  0xd7   : > { %v672_v10 = vsub.f32 %v370_v36, %v655_v6  ;;  %v674_v12 = vsub.f32 %v441_v37, %v663_v7 }
  0xd8   : > { %v372_v45 = vpop.f32.mrf.mxu0  ;;  %v443_v46 = vpop.f32.mrf.mxu1 }
  0xd9   : > { %v673_v14 = vsub.f32 %v372_v45, %v659_v8  ;;  %v675_v17 = vsub.f32 %v443_v46, %v667_v9 }
  0xe0   : > { %v528_v49 = vpop.f32.mrf.mxu0  ;;  %v599_v50 = vpop.f32.mrf.mxu1 }
  0xe1   : > { %v627_v51 = vsub.f32 %v610_v43, %v528_v49  ;;  %v629_v52 = vsub.f32 %v618_v44, %v599_v50 }
  0xe2   : > { %v530_v53 = vpop.f32.mrf.mxu0  ;;  %v601_v54 = vpop.f32.mrf.mxu1 }
  0xe3   : > { %v631_v55 = vmul.f32 1.442695, %v627_v51  ;;  %v635_v56 = vmul.f32 1.442695, %v629_v52  ;;  %v628_v57 = vsub.f32 %v614_v47, %v530_v53  ;;  %v630_v58 = vsub.f32 %v622_v48, %v601_v54 }
  0xe5   : > { %835 = vpow2.f32 %v631_v55  ;;  %v633_v59 = vmul.f32 1.442695, %v628_v57  ;;  %v637_v60 = vmul.f32 1.442695, %v630_v58 }
  0xe6   : > { %837 = vpow2.f32 %v635_v56 }
  0xe7   : > { %839 = vpow2.f32 %v633_v59 }
  0xe8   : > { %841 = vpow2.f32 %v637_v60 }
  0xf2   : > { %v836_v61 = vpop.eup %835 }
  0xf3   : > { %v838_v62 = vpop.eup %837  ;;  %v639_v63 = vadd.f32 1.0, %v836_v61 }
  0xf4   : > { %v840_v0 = vpop.eup %839  ;;  %v641_v1 = vadd.f32 1.0, %v838_v62 }
  0xf5   : > { %v842_v2 = vpop.eup %841  ;;  %843 = vrcp.f32 %v639_v63  ;;  %v640_v3 = vadd.f32 1.0, %v840_v0 }
  0xf6   : > { %845 = vrcp.f32 %v641_v1  ;;  %v642_v4 = vadd.f32 1.0, %v842_v2 }
  0xf7   : > { %847 = vrcp.f32 %v640_v3 }
  0xf8   : > { %849 = vrcp.f32 %v642_v4 }
 0x102   : > { %v844_v11 = vpop.eup %843 }
 0x103   : > { %v846_v13 = vpop.eup %845  ;;  %v676_v15 = vmul.f32 %v844_v11, %v672_v10 }
 0x104   : > { %v848_v16 = vpop.eup %847  ;;  %v678_v18 = vmul.f32 %v846_v13, %v674_v12 }
 0x105   : > { %v850_v19 = vpop.eup %849  ;;  %v680_v20 = vadd.f32 %v676_v15, %v655_v6  ;;  %v677_v21 = vmul.f32 %v848_v16, %v673_v14 }
 0x106   : > { %v682_v22 = vadd.f32 %v678_v18, %v663_v7  ;;  %v679_v23 = vmul.f32 %v850_v19, %v675_v17 }
 0x107   : > { %684 = vst [vmem:[%s281_s9] sm:$0xff] %v680_v20  ;;  %v681_v24 = vadd.f32 %v677_v21, %v659_v8 }
 0x108   : > { %686 = vst [vmem:[%s281_s9 + $0x10] sm:$0xff] %v682_v22  ;;  %v683_v25 = vadd.f32 %v679_v23, %v667_v9 }
 0x109   : > { %685 = vst [vmem:[%s281_s9 + $0x8] sm:$0xff] %v681_v24 }
 0x10a   : > { %687 = vst [vmem:[%s281_s9 + $0x18] sm:$0xff] %v683_v25 }
 0x10b PF: > { %s15_s20 = sadd.s32 1, %s873_s20   ;;  %s1055_s18 = smov %s869_s19 }
 0x10c   : > { %p12_p5 = scmp.ge.s32.totalorder %s15_s20, 4   ;;  %s1056_s19 = smov %s1058_s21 }
 0x10e   :  { %14 = sbr.rel (!%p12_p5) target bundleno = 2 (0x2), region = 76 }

</bundles_post_ra>
